<compile_context>
chip_gen: v6e
topology: v6e:2x2x1
jax: 0.10.0
libtpu: 0.0.40
codegen_flags: <defaults>
</compile_context>

<pallas_src>
import functools

import jax
import jax.numpy as jnp
from jax.experimental import pallas as pl
from jax.experimental.pallas import tpu as pltpu


def _round_up(v: int, m: int) -> int:
    return (v + m - 1) // m * m


# ---------------------------------------------------------------------------
# Fused two-layer GCN kernel
# ---------------------------------------------------------------------------
def _fused_gcn_kernel(a_ref, x_ref, w1_ref, w2_ref, o_ref, h_ref, acc_ref, *,
                      bm: int, bk: int):
    s = pl.program_id(0)          # stage / layer (0 or 1)
    i = pl.program_id(1)          # output row block (nodes)
    k = pl.program_id(2)          # contraction block over A's columns (nodes)
    nk = pl.num_programs(2)

    @pl.when(k == 0)
    def _():
        acc_ref[...] = jnp.zeros_like(acc_ref)

    off = pl.multiple_of(k * bk, bk)

    # ---- accumulate the N-contraction:  acc += A_s[i, k] @ feat[k] ----------
    @pl.when(s == 0)
    def _():
        xk = x_ref[pl.ds(off, bk), :]            # bf16 X slice (VMEM-resident)
        acc_ref[...] += jnp.dot(a_ref[...], xk,
                                preferred_element_type=jnp.float32)

    @pl.when(s == 1)
    def _():
        hk = h_ref[pl.ds(off, bk), :]            # bf16 hidden slice (VMEM)
        acc_ref[...] += jnp.dot(a_ref[...], hk,
                                preferred_element_type=jnp.float32)

    # ---- finalize this row block with the tiny resident weight matrices -----
    # (acc is downcast to bf16 for the W matmul: intentional precision trade.)
    @pl.when((k == nk - 1) & (s == 0))
    def _():
        acc_b = acc_ref[...].astype(jnp.bfloat16)
        h_tile = jnp.maximum(
            jnp.dot(acc_b, w1_ref[...], preferred_element_type=jnp.float32),
            0.0)
        row = pl.multiple_of(i * bm, bm)
        h_ref[pl.ds(row, bm), :] = h_tile.astype(h_ref.dtype)
        # No output write in stage 0: the out block index is constant here, so
        # the pipeline emits no stage-0 HBM writebacks.

    @pl.when((k == nk - 1) & (s == 1))
    def _():
        acc_b = acc_ref[...].astype(jnp.bfloat16)
        o_ref[...] = jnp.dot(acc_b, w2_ref[...],
                             preferred_element_type=jnp.float32)


# ---------------------------------------------------------------------------
# VMEM budgeting / tile selection
# ---------------------------------------------------------------------------
def _pick_vmem_limit_bytes() -> int:
    cap = None
    try:
        info = pltpu.get_tpu_info()
        cap = int(getattr(info, "vmem_capacity_bytes", 0)) or None
    except Exception:
        cap = None
    if cap is None:
        cap = 128 << 20                      # conservative fallback (v5e/v6e)
    # leave headroom for Mosaic internal scratch; ~48 MiB on v7x, ~100 MiB on
    # the 128 MiB generations.
    return int(min(cap - (16 << 20), 100 << 20))


def _vmem_working_set(npad: int, fp: int, bm: int, bk: int) -> int:
    # Conservative: assume double-buffering on every BlockSpec operand.
    h_scratch = npad * fp * 2            # bf16 hidden activations (scratch)
    acc = bm * fp * 4                    # f32 accumulator (scratch)
    a_tiles = 2 * bm * bk * 2            # bf16 A tile, double-buffered
    x_res = 2 * npad * fp * 2            # bf16 X, VMEM-resident
    weights = 2 * 2 * fp * fp * 2        # W1 + W2 resident
    out_blk = 2 * bm * fp * 4            # f32 output block
    return h_scratch + acc + a_tiles + x_res + weights + out_blk


def _choose_tiles(n: int, fp: int, bm: int, bk: int, vmem_budget: int):
    lane = 128
    n128 = _round_up(n, lane)
    bm = max(lane, (bm // lane) * lane)
    bm = min(bm, n128)
    bk = max(bm, (bk // bm) * bm)        # bk is a multiple of bm
    bk = min(bk, _round_up(n, bm))       # don't pad far beyond the graph

    def plan(bm_, bk_):
        npad_ = _round_up(n, bk_)        # divisible by bm_ since bk_ % bm_ == 0
        return npad_, _vmem_working_set(npad_, fp, bm_, bk_)

    npad, need = plan(bm, bk)
    # Prefer shrinking the contraction tile first, then the row tile.
    while need > vmem_budget and bk > bm:
        bk = max(bm, ((bk // 2) // bm) * bm)
        npad, need = plan(bm, bk)
    while need > vmem_budget and bm > lane:
        bm = max(lane, ((bm // 2) // lane) * lane)
        bk = max(bm, (bk // bm) * bm)
        npad, need = plan(bm, bk)
    if need > vmem_budget:
        # TODO(synk): for very large graphs spill h (and X) to HBM as bf16 and
        # un-fuse the row axis, which also enables the v7x two-TensorCore split.
        raise ValueError(
            f"GCN working set {need / 2**20:.1f} MiB exceeds VMEM budget "
            f"{vmem_budget / 2**20:.1f} MiB; graph too large for the fused "
            f"VMEM-resident-h kernel.")
    return bm, bk, npad


# ---------------------------------------------------------------------------
# GCN_test forward (wrapper: one-shot padded adjacency + one fused pallas_call)
# ---------------------------------------------------------------------------
def gcn_test_forward(x, edge_index1, edge_index2, edge_weight1, edge_weight2,
                     w1, w2, *, bm: int = 256, bk: int = 1024):
    n, nfeat = x.shape
    nhid = w1.shape[1]
    nclass = w2.shape[1]

    fp = _round_up(max(nfeat, nhid, nclass), 128)   # lane-dense feature width

    vmem_limit = _pick_vmem_limit_bytes()
    bm, bk, npad = _choose_tiles(n, fp, bm, bk, vmem_limit - (8 << 20))
    n_row = npad // bm
    n_k = npad // bk

    # Plain-JAX glue: padded dense adjacencies built in ONE shot.
    # A_l[dst, src] = w (sum aggregation; duplicate edges accumulate in f32),
    # then a single cast to bf16 for the MXU stream.
    # TODO(synk): replace this dense N^2 path with a sparse/blocked SpMM using
    # PrefetchScalarGridSpec scalar prefetch (CSR offsets / block mask driving
    # the A index_map) for graphs where E << N^2.
    adj = jnp.zeros((2, npad, npad), dtype=jnp.float32)
    adj = adj.at[0, edge_index1[1], edge_index1[0]].add(
        edge_weight1.astype(jnp.float32))
    adj = adj.at[1, edge_index2[1], edge_index2[0]].add(
        edge_weight2.astype(jnp.float32))
    a = adj.astype(jnp.bfloat16)

    xp = jnp.zeros((npad, fp), dtype=jnp.bfloat16)
    xp = xp.at[:n, :nfeat].set(x.astype(jnp.bfloat16))
    w1p = jnp.zeros((fp, fp), dtype=jnp.bfloat16)
    w1p = w1p.at[:nfeat, :nhid].set(w1.astype(jnp.bfloat16))
    w2p = jnp.zeros((fp, fp), dtype=jnp.bfloat16)
    w2p = w2p.at[:nhid, :nclass].set(w2.astype(jnp.bfloat16))

    kernel = functools.partial(_fused_gcn_kernel, bm=bm, bk=bk)

    out_p = pl.pallas_call(
        kernel,
        out_shape=jax.ShapeDtypeStruct((npad, fp), jnp.float32),
        grid_spec=pltpu.PrefetchScalarGridSpec(
            num_scalar_prefetch=0,
            grid=(2, n_row, n_k),
            in_specs=[
                # stacked adjacencies [A1; A2]: one (bm, bk) bf16 tile per step.
                pl.BlockSpec((None, bm, bk), lambda s, i, k: (s, i, k)),
                # node features: fully VMEM-resident (fetched once).
                pl.BlockSpec((npad, fp), lambda s, i, k: (0, 0)),
                # weights: tiny, fully resident.
                pl.BlockSpec((fp, fp), lambda s, i, k: (0, 0)),
                pl.BlockSpec((fp, fp), lambda s, i, k: (0, 0)),
            ],
            # Constant block index during stage 0 => no stage-0 writebacks;
            # each row block is written exactly once in stage 1.
            out_specs=pl.BlockSpec((bm, fp), lambda s, i, k: (i * s, 0)),
            scratch_shapes=[
                pltpu.VMEM((npad, fp), jnp.bfloat16),   # h: hidden activations
                pltpu.VMEM((bm, fp), jnp.float32),      # f32 accumulator
            ],
        ),
        compiler_params=pltpu.CompilerParams(
            # stage + k are reductions; the row axis stays sequential because
            # both stages share the VMEM-resident h scratch (see header note).
            dimension_semantics=("arbitrary", "arbitrary", "arbitrary"),
            vmem_limit_bytes=vmem_limit,
        ),
    )(a, xp, w1p, w2p)

    return out_p[:n, :nclass]


# ---------------------------------------------------------------------------
# Reference helper (plain JAX, used only for validation)
# ---------------------------------------------------------------------------
def _dense_adjacency(edge_index, edge_weight, num_nodes):
    adj = jnp.zeros((num_nodes, num_nodes), dtype=jnp.float32)
    return adj.at[edge_index[1], edge_index[0]].add(
        edge_weight.astype(jnp.float32))


if __name__ == "__main__":
    # Small deterministic example: 200 nodes pad to 256; bm=128, bk=256
    # exercises the decoupled row/contraction tiling -> grid (2, 2, 1).
    num_nodes = 200
    nfeat, nhid, nclass = 8, 32, 4
    num_edges = 800

    key = jax.random.PRNGKey(0)
    k_x, k_w1, k_w2, k_e1, k_e2, k_ew1, k_ew2 = jax.random.split(key, 7)

    x = jax.random.normal(k_x, (num_nodes, nfeat), dtype=jnp.float32)
    w1 = jax.random.normal(k_w1, (nfeat, nhid), dtype=jnp.float32) * (
        (2.0 / (nfeat + nhid)) ** 0.5)
    w2 = jax.random.normal(k_w2, (nhid, nclass), dtype=jnp.float32) * (
        (2.0 / (nhid + nclass)) ** 0.5)

    edge_index1 = jax.random.randint(k_e1, (2, num_edges), 0, num_nodes,
                                     dtype=jnp.int32)
    edge_index2 = jax.random.randint(k_e2, (2, num_edges), 0, num_nodes,
                                     dtype=jnp.int32)
    edge_weight1 = jax.random.uniform(k_ew1, (num_edges,), dtype=jnp.float32)
    edge_weight2 = jax.random.uniform(k_ew2, (num_edges,), dtype=jnp.float32)

    out = gcn_test_forward(x, edge_index1, edge_index2,
                           edge_weight1, edge_weight2, w1, w2,
                           bm=128, bk=256)
    out = jax.block_until_ready(out)
    assert out.shape == (num_nodes, nclass)

    # --- references ---------------------------------------------------------
    a1 = _dense_adjacency(edge_index1, edge_weight1, num_nodes)
    a2 = _dense_adjacency(edge_index2, edge_weight2, num_nodes)

    # exact f32 semantics of the PyTorch module
    ref_f32 = a2 @ (jnp.maximum(a1 @ (x @ w1), 0.0) @ w2)

    # same math at the kernel's precision (bf16 inputs, f32 accumulation)
    def _b(v):
        return v.astype(jnp.bfloat16).astype(jnp.float32)

    s1 = _b(_b(a1) @ _b(x))
    h_ref = _b(jnp.maximum(s1 @ _b(w1), 0.0))
    s2 = _b(_b(a2) @ h_ref)
    ref_bf16 = s2 @ _b(w2)

    assert jnp.allclose(out, ref_bf16, atol=1e-2, rtol=1e-2), (
        "max |diff| vs bf16-emulated ref = %f"
        % float(jnp.max(jnp.abs(out - ref_bf16))))
    assert jnp.allclose(out, ref_f32, atol=3e-1, rtol=5e-2), (
        "max |diff| vs f32 ref = %f" % float(jnp.max(jnp.abs(out - ref_f32))))

    print("KERNEL_OK")
</pallas_src>

<mosaic_0001>
module attributes {stable_mosaic.version = 11 : i64} {
  func.func @_fused_gcn_kernel(%arg0: i32, %arg1: i32, %arg2: i32, %arg3: memref<1x128x256xbf16, #tpu.memory_space<vmem>>, %arg4: memref<256x128xbf16, #tpu.memory_space<vmem>>, %arg5: memref<128x128xbf16, #tpu.memory_space<vmem>>, %arg6: memref<128x128xbf16, #tpu.memory_space<vmem>>, %arg7: memref<128x128xf32, #tpu.memory_space<vmem>>, %arg8: memref<256x128xbf16, #tpu.memory_space<vmem>>, %arg9: memref<128x128xf32, #tpu.memory_space<vmem>>) attributes {dimension_semantics = [#tpu.dimension_semantics<arbitrary>, #tpu.dimension_semantics<arbitrary>, #tpu.dimension_semantics<arbitrary>], iteration_bounds = array<i64: 2, 2, 1>, scalar_prefetch = 0 : i64, scratch_operands = 2 : i64, tpu.core_type = #tpu.core_type<tc>, window_params = [{transform_indices = @transform_0, window_bounds = array<i64: 1, 128, 256>}, {pipeline_mode = #tpu.pipeline_mode<synchronous>, transform_indices = @transform_1, window_bounds = array<i64: 256, 128>}, {pipeline_mode = #tpu.pipeline_mode<synchronous>, transform_indices = @transform_2, window_bounds = array<i64: 128, 128>}, {pipeline_mode = #tpu.pipeline_mode<synchronous>, transform_indices = @transform_3, window_bounds = array<i64: 128, 128>}, {transform_indices = @transform_4, window_bounds = array<i64: 128, 128>}]} {
    %c0_i32 = arith.constant 0 : i32
    %0 = arith.cmpi eq, %arg2, %c0_i32 : i32
    %1 = arith.extui %0 : i1 to i32
    %c0_i32_0 = arith.constant 0 : i32
    %2 = arith.cmpi ne, %1, %c0_i32_0 : i32
    scf.if %2 {
      %cst = arith.constant 0.000000e+00 : f32
      %21 = vector.broadcast %cst : f32 to vector<128x128xf32>
      %c0 = arith.constant 0 : index
      %c0_10 = arith.constant 0 : index
      %22 = vector.load %arg9[%c0, %c0_10] : memref<128x128xf32, #tpu.memory_space<vmem>>, vector<128x128xf32>
      tpu.vector_store %arg9[%c0, %c0_10], %21 {strides = array<i32>} : memref<128x128xf32, #tpu.memory_space<vmem>>, vector<128x128xf32>,
    } else {
    }
    %c256_i32 = arith.constant 256 : i32
    %3 = arith.muli %arg2, %c256_i32 : i32
    %4 = tpu.assume_multiple %3, 256 : i32
    %c0_i32_1 = arith.constant 0 : i32
    %5 = arith.cmpi eq, %arg0, %c0_i32_1 : i32
    %6 = arith.extui %5 : i1 to i32
    %c0_i32_2 = arith.constant 0 : i32
    %7 = arith.cmpi ne, %6, %c0_i32_2 : i32
    scf.if %7 {
      %21 = arith.index_cast %4 : i32 to index
      %c0 = arith.constant 0 : index
      %22 = vector.load %arg4[%21, %c0] : memref<256x128xbf16, #tpu.memory_space<vmem>>, vector<256x128xbf16>
      %c0_10 = arith.constant 0 : index
      %c0_11 = arith.constant 0 : index
      %23 = vector.load %arg9[%c0_10, %c0_11] : memref<128x128xf32, #tpu.memory_space<vmem>>, vector<128x128xf32>
      %c0_12 = arith.constant 0 : index
      %c0_13 = arith.constant 0 : index
      %c0_14 = arith.constant 0 : index
      %24 = vector.load %arg3[%c0_12, %c0_13, %c0_14] : memref<1x128x256xbf16, #tpu.memory_space<vmem>>, vector<1x128x256xbf16>
      %25 = vector.shape_cast %24 : vector<1x128x256xbf16> to vector<128x256xbf16>
      %cst = arith.constant dense<0.000000e+00> : vector<128x128xf32>
      %26 = tpu.matmul %25, %22, %cst {dimension_numbers = #tpu.dot_dimension_numbers<[1], [0], [0], [1], [0, 0, 1, 1], [], []>} : vector<128x256xbf16>, vector<256x128xbf16>, vector<128x128xf32> -> vector<128x128xf32>
      %27 = arith.addf %23, %26 : vector<128x128xf32>
      %c0_15 = arith.constant 0 : index
      %c0_16 = arith.constant 0 : index
      %28 = vector.load %arg9[%c0_15, %c0_16] : memref<128x128xf32, #tpu.memory_space<vmem>>, vector<128x128xf32>
      tpu.vector_store %arg9[%c0_15, %c0_16], %27 {strides = array<i32>} : memref<128x128xf32, #tpu.memory_space<vmem>>, vector<128x128xf32>,
    } else {
    }
    %c1_i32 = arith.constant 1 : i32
    %8 = arith.cmpi eq, %arg0, %c1_i32 : i32
    %9 = arith.extui %8 : i1 to i32
    %c0_i32_3 = arith.constant 0 : i32
    %10 = arith.cmpi ne, %9, %c0_i32_3 : i32
    scf.if %10 {
      %21 = arith.index_cast %4 : i32 to index
      %c0 = arith.constant 0 : index
      %22 = vector.load %arg8[%21, %c0] : memref<256x128xbf16, #tpu.memory_space<vmem>>, vector<256x128xbf16>
      %c0_10 = arith.constant 0 : index
      %c0_11 = arith.constant 0 : index
      %23 = vector.load %arg9[%c0_10, %c0_11] : memref<128x128xf32, #tpu.memory_space<vmem>>, vector<128x128xf32>
      %c0_12 = arith.constant 0 : index
      %c0_13 = arith.constant 0 : index
      %c0_14 = arith.constant 0 : index
      %24 = vector.load %arg3[%c0_12, %c0_13, %c0_14] : memref<1x128x256xbf16, #tpu.memory_space<vmem>>, vector<1x128x256xbf16>
      %25 = vector.shape_cast %24 : vector<1x128x256xbf16> to vector<128x256xbf16>
      %cst = arith.constant dense<0.000000e+00> : vector<128x128xf32>
      %26 = tpu.matmul %25, %22, %cst {dimension_numbers = #tpu.dot_dimension_numbers<[1], [0], [0], [1], [0, 0, 1, 1], [], []>} : vector<128x256xbf16>, vector<256x128xbf16>, vector<128x128xf32> -> vector<128x128xf32>
      %27 = arith.addf %23, %26 : vector<128x128xf32>
      %c0_15 = arith.constant 0 : index
      %c0_16 = arith.constant 0 : index
      %28 = vector.load %arg9[%c0_15, %c0_16] : memref<128x128xf32, #tpu.memory_space<vmem>>, vector<128x128xf32>
      tpu.vector_store %arg9[%c0_15, %c0_16], %27 {strides = array<i32>} : memref<128x128xf32, #tpu.memory_space<vmem>>, vector<128x128xf32>,
    } else {
    }
    %c0_i32_4 = arith.constant 0 : i32
    %11 = arith.cmpi eq, %arg2, %c0_i32_4 : i32
    %c0_i32_5 = arith.constant 0 : i32
    %12 = arith.cmpi eq, %arg0, %c0_i32_5 : i32
    %13 = arith.andi %11, %12 : i1
    %14 = arith.extui %13 : i1 to i32
    %c0_i32_6 = arith.constant 0 : i32
    %15 = arith.cmpi ne, %14, %c0_i32_6 : i32
    scf.if %15 {
      %c0 = arith.constant 0 : index
      %c0_10 = arith.constant 0 : index
      %21 = vector.load %arg9[%c0, %c0_10] : memref<128x128xf32, #tpu.memory_space<vmem>>, vector<128x128xf32>
      %22 = arith.truncf %21 : vector<128x128xf32> to vector<128x128xbf16>
      %c0_11 = arith.constant 0 : index
      %c0_12 = arith.constant 0 : index
      %23 = vector.load %arg5[%c0_11, %c0_12] : memref<128x128xbf16, #tpu.memory_space<vmem>>, vector<128x128xbf16>
      %cst = arith.constant dense<0.000000e+00> : vector<128x128xf32>
      %24 = tpu.matmul %22, %23, %cst {dimension_numbers = #tpu.dot_dimension_numbers<[1], [0], [0], [1], [0, 0, 1, 1], [], []>} : vector<128x128xbf16>, vector<128x128xbf16>, vector<128x128xf32> -> vector<128x128xf32>
      %cst_13 = arith.constant 0.000000e+00 : f32
      %25 = vector.broadcast %cst_13 : f32 to vector<128x128xf32>
      %26 = arith.maximumf %24, %25 : vector<128x128xf32>
      %c128_i32 = arith.constant 128 : i32
      %27 = arith.muli %arg1, %c128_i32 : i32
      %28 = tpu.assume_multiple %27, 128 : i32
      %29 = arith.truncf %26 : vector<128x128xf32> to vector<128x128xbf16>
      %30 = arith.index_cast %28 : i32 to index
      %c0_14 = arith.constant 0 : index
      %31 = vector.load %arg8[%30, %c0_14] : memref<256x128xbf16, #tpu.memory_space<vmem>>, vector<128x128xbf16>
      tpu.vector_store %arg8[%30, %c0_14], %29 {strides = array<i32>} : memref<256x128xbf16, #tpu.memory_space<vmem>>, vector<128x128xbf16>,
    } else {
    }
    %c0_i32_7 = arith.constant 0 : i32
    %16 = arith.cmpi eq, %arg2, %c0_i32_7 : i32
    %c1_i32_8 = arith.constant 1 : i32
    %17 = arith.cmpi eq, %arg0, %c1_i32_8 : i32
    %18 = arith.andi %16, %17 : i1
    %19 = arith.extui %18 : i1 to i32
    %c0_i32_9 = arith.constant 0 : i32
    %20 = arith.cmpi ne, %19, %c0_i32_9 : i32
    scf.if %20 {
      %c0 = arith.constant 0 : index
      %c0_10 = arith.constant 0 : index
      %21 = vector.load %arg9[%c0, %c0_10] : memref<128x128xf32, #tpu.memory_space<vmem>>, vector<128x128xf32>
      %22 = arith.truncf %21 : vector<128x128xf32> to vector<128x128xbf16>
      %c0_11 = arith.constant 0 : index
      %c0_12 = arith.constant 0 : index
      %23 = vector.load %arg6[%c0_11, %c0_12] : memref<128x128xbf16, #tpu.memory_space<vmem>>, vector<128x128xbf16>
      %cst = arith.constant dense<0.000000e+00> : vector<128x128xf32>
      %24 = tpu.matmul %22, %23, %cst {dimension_numbers = #tpu.dot_dimension_numbers<[1], [0], [0], [1], [0, 0, 1, 1], [], []>} : vector<128x128xbf16>, vector<128x128xbf16>, vector<128x128xf32> -> vector<128x128xf32>
      %c0_13 = arith.constant 0 : index
      %c0_14 = arith.constant 0 : index
      %25 = vector.load %arg7[%c0_13, %c0_14] : memref<128x128xf32, #tpu.memory_space<vmem>>, vector<128x128xf32>
      tpu.vector_store %arg7[%c0_13, %c0_14], %24 {strides = array<i32>} : memref<128x128xf32, #tpu.memory_space<vmem>>, vector<128x128xf32>,
    } else {
    }
    return
  }
  func.func @transform_0(%arg0: i32, %arg1: i32, %arg2: i32) -> (i32, i32, i32) {
    %c0_i32 = arith.constant 0 : i32
    return %arg0, %arg1, %arg2 : i32, i32, i32
  }
  func.func @transform_1(%arg0: i32, %arg1: i32, %arg2: i32) -> (i32, i32) {
    %c0_i32 = arith.constant 0 : i32
    %c0_i32_0 = arith.constant 0 : i32
    %c0_i32_1 = arith.constant 0 : i32
    return %c0_i32, %c0_i32_0 : i32, i32
  }
  func.func @transform_2(%arg0: i32, %arg1: i32, %arg2: i32) -> (i32, i32) {
    %c0_i32 = arith.constant 0 : i32
    %c0_i32_0 = arith.constant 0 : i32
    %c0_i32_1 = arith.constant 0 : i32
    return %c0_i32, %c0_i32_0 : i32, i32
  }
  func.func @transform_3(%arg0: i32, %arg1: i32, %arg2: i32) -> (i32, i32) {
    %c0_i32 = arith.constant 0 : i32
    %c0_i32_0 = arith.constant 0 : i32
    %c0_i32_1 = arith.constant 0 : i32
    return %c0_i32, %c0_i32_0 : i32, i32
  }
  func.func @transform_4(%arg0: i32, %arg1: i32, %arg2: i32) -> (i32, i32) {
    %0 = arith.muli %arg1, %arg0 : i32
    %c0_i32 = arith.constant 0 : i32
    %c0_i32_0 = arith.constant 0 : i32
    return %0, %c0_i32 : i32, i32
  }
}

</mosaic_0001>

<bundles_post_ra>
// kernel: tpu_custom_call.1
= control target key start
LH: loop header
LB: loop body
LE: loop exit
PB: predicated region body
PF: predicated region fallthrough
CT: control target
= control target key end

     0   :  { %s3016_s0 = inlined_call_operand.hbm [shape: bf16[2,256,256], index: 0, kind: input, shape index: {}]   ;;  %s3017_s1 = inlined_call_operand.hbm [shape: bf16[256,128], index: 1, kind: input, shape index: {}]   ;;  %s3018_s2 = inlined_call_operand.hbm [shape: bf16[128,128], index: 2, kind: input, shape index: {}]   ;;  %s3019_s3 = inlined_call_operand.hbm [shape: bf16[128,128], index: 3, kind: input, shape index: {}]   ;;  %s3020_s4 = inlined_call_operand.hbm [shape: f32[256,128], index: 4, kind: output, shape index: {}]  }
   0x1   :  { %3038 = sst [smem:[#allocation26_spill]] %s3017_s1 }
   0x2   :  { %3039 = sst [smem:[#allocation27_spill]] %s3018_s2 }
   0x3   :  { %3040 = sst [smem:[#allocation28_spill]] %s3019_s3 }
   0x4   :  { %3041 = sst [smem:[#allocation29_spill]] %s3020_s4 }
   0x5   :  { %9 = vsyncpa [#allocation5], 0 }
   0x6   :  { %11 = vsyncpa [#allocation5 + $0x1], 0 }
   0x7   :  { %12 = vsyncpa [#allocation8], 0 }
   0x8   :  { %13 = vsyncpa [#allocation11], 0 }
   0x9   :  { %14 = vsyncpa [#allocation6], 0 }
   0xa   :  { %16 = vsyncpa [#allocation6 + $0x1], 0  ;;  %s2696_s15 = smov 0   ;;  %s2698_s16 = smov 0  }
   0xb   :  { %s2700_s17 = smov 0   ;;  %s2702_s18 = smov 0  }
   0xc   :  { %s2704_s19 = smov 0   ;;  %s2706_s20 = smov 0  }
   0xd   :  { %s2708_s21 = smov 0   ;;  %s2710_s22 = smov 0  }
   0xe   :  { %s2712_s23 = smov 0   ;;  %s2714_s24 = smov 0  }
   0xf   :  { %s2716_s25 = smov 0  }
  0x10 LB: > { %3042 = sst [smem:[#allocation17_spill]] %s2617_s15  ;;  %s1707_s26 = sadd.s32 4294967295, %s2657_s25   ;;  %s2657_s25 = sphi %s2716_s25, %s22_s25   ;;  %s2653_s24 = sphi %s2714_s24, %s3094_s24   ;;  %s2649_s23 = sphi %s2712_s23, %s3093_s23   ;;  %s2645_s22 = sphi %s2710_s22, %s3092_s22   ;;  %s2641_s21 = sphi %s2708_s21, %s3084_s21   ;;  %s2637_s20 = sphi %s2706_s20, %s3091_s20   ;;  %s2633_s19 = sphi %s2704_s19, %s3090_s19   ;;  %s2629_s18 = sphi %s2702_s18, %s3089_s18   ;;  %s2625_s17 = sphi %s2700_s17, %s3088_s17   ;;  %s2621_s16 = sphi %s2698_s16, %s3087_s16   ;;  %s2617_s15 = sphi %s2696_s15, %s3086_s15  }
  0x11   : > { %3043 = sst [smem:[#allocation18_spill]] %s2621_s16  ;;  %s1708_s27 = sadd.s32 4294967294, %s2657_s25  }
  0x12   : > { %3044 = sst [smem:[#allocation19_spill]] %s2641_s21  ;;  %p65_p0 = scmp.ne.s32.totalorder %s2633_s19, %s2629_s18 }
  0x13   : > { %3045 = sst [smem:[#allocation20_spill]] %s2645_s22  ;;  %p2752_p1 = scmp.eq.s32.totalorder %s1707_s26, 0 }
  0x14   : > { %3046 = sst [smem:[#allocation21_spill]] %s2649_s23  ;;  %p153_p2 = scmp.ne.s32.totalorder %s2625_s17, %s2621_s16 }
  0x15   : > { %s3047_s28 = scalar_select %p2752_p1, 1, 0 }
  0x16   : > { %p2761_p3 = por %p2752_p1, %p65_p0  ;;  %p154_p4 = scmp.eq.s32.totalorder %s1707_s26, 3 }
  0x17   : > { %3048 = sst [smem:[#allocation22_spill]] %s3047_s28  ;;  %p159_p5 = scmp.ne.s32.totalorder %s2621_s16, %s2617_s15 }
  0x18   : > { %s3049_s30 = scalar_select %p2761_p3, 1, 0 }
  0x19   : > { %p160_p6 = scmp.eq.s32.totalorder %s1708_s27, 3  ;;  %p2767_p7 = por %p154_p4, %p153_p2 }
  0x1a   : > { %p1709_p8 = scmp.ge.s32.totalorder %s2657_s25, 1  ;;  %p167_p10 = scmp.lt.s32.totalorder %s2657_s25, 5 }
  0x1b   : > { %s3050_s5 = scalar_select %p2767_p7, 1, 0 }
  0x1c   : > { %p2772_p9 = por %p160_p6, %p159_p5  ;;  %p2777_p11 = pnand %p1709_p8, %p167_p10 }
  0x1d   : > { %3051 = sst [smem:[#allocation23_spill]] %s3050_s5  ;;  %s2659_s8 = smov [#allocation7]  }
  0x1e   : > { %s3052_s6 = scalar_select %p2772_p9, 1, 0 }
  0x1f   : > { %s179_s9 = sshll.u32 %s2659_s8, 4  ;;  %p2203_p12 = pneg %p2777_p11  ;;  %s180_s9 = int_to_ptr.vmem [resolvable:$true] %s179_s9 }
  0x20   : > { %3053 = sst [smem:[#allocation24_spill]] %s3052_s6  ;;  %s2660_s11 = smov [#allocation9]  }
  0x21   : > { %p2785_p13 = pnand %p2203_p12, %p2752_p1  ;;  %s192_s12 = sshll.u32 %s2660_s11, 4  ;;  %s193_s12 = int_to_ptr.vmem [resolvable:$true] %s192_s12 }
  0x22   : > { %s2661_s13 = smov [#allocation10]   ;;  %s2434_s18 = scalar_lea.vmem %s180_s9, 2048 }
  0x23   : > { %s205_s14 = sshll.u32 %s2661_s13, 4  ;;  %p2425_p0 = pneg %p2785_p13  ;;  %s206_s14 = int_to_ptr.vmem [resolvable:$true] %s205_s14 }
  0x24   : > { %p2435_p2 = scmp.ne.s32.totalorder %s180_s9, %s2434_s18  ;;  %p2442_p6 = scmp.lt.s32.totalorder %s180_s9, %s180_s9 }
  0x25   : > { %p2443_p8 = scmp.lt.s32.totalorder %s2434_s18, %s2434_s18 }
  0x26   : > { %p2437_p4 = pnand %p2435_p2, %p2425_p0 }
  0x27   : > { %p2444_p10 = por %p2443_p8, %p2442_p6 }
  0x28   : > { %p2438_p5 = pneg %p2437_p4 }
  0x2a   : > { %p2445_p12 = pnand %p2444_p10, %p2438_p5 }
  0x2c   : > { %2448 = shalt.err (!%p2445_p12)
}
  0x2d   : > { %s2662_s26 = smov 64   ;;  %s2663_s27 = smov 4  }
  0x2e   : > { %s3056_s1 = sld [smem:[#allocation26_spill]]  ;;  %s2460_s13 = scalar_lea.vmem %s193_s12, 1024 }
  0x2f   : > { %p2461_p9 = scmp.ne.s32.totalorder %s193_s12, %s2460_s13  ;;  %p2468_p7 = scmp.lt.s32.totalorder %s193_s12, %s193_s12 }
  0x30   : > { %p2469_p1 = scmp.lt.s32.totalorder %s2460_s13, %s2460_s13 }
  0x31   : > { %p2463_p2 = pnand %p2461_p9, %p2425_p0 }
  0x32   : > { %p2470_p6 = por %p2469_p1, %p2468_p7 }
  0x33   : > { %p2464_p4 = pneg %p2463_p2 }
  0x34   : > { %2206 = dma.hbm_to_vmem [thread:$0]  (!%p2785_p13), %s3056_s1, 2048, %s180_s9, [#allocation8], %s2662_s26, %s2662_s26, %s2663_s27  }
  0x35   : > { %p2471_p5 = pnand %p2470_p6, %p2464_p4 }
  0x37   : > { %2474 = shalt.err (!%p2471_p5)
}
  0x38   : > { %s3057_s2 = sld [smem:[#allocation27_spill]]  ;;  %s2486_s9 = scalar_lea.vmem %s206_s14, 1024 }
  0x39   : > { %p2487_p8 = scmp.ne.s32.totalorder %s206_s14, %s2486_s9  ;;  %p2494_p12 = scmp.lt.s32.totalorder %s206_s14, %s206_s14 }
  0x3a   : > { %p2495_p2 = scmp.lt.s32.totalorder %s2486_s9, %s2486_s9 }
  0x3b   : > { %p2489_p10 = pnand %p2487_p8, %p2425_p0 }
  0x3c   : > { %p2496_p3 = por %p2495_p2, %p2494_p12 }
  0x3d   : > { %p2490_p9 = pneg %p2489_p10 }
  0x3e   : > { %2209 = dma.hbm_to_vmem [thread:$0]  (!%p2785_p13), %s3057_s2, 1024, %s193_s12, [#allocation8], %s2662_s26, %s2662_s26, %s2663_s27  }
  0x3f   : > { %p2497_p1 = pnand %p2496_p3, %p2490_p9 }
  0x41   : > { %2500 = shalt.err (!%p2497_p1)
}
  0x42   : > { %s3058_s3 = sld [smem:[#allocation28_spill]]  ;;  %s37_s29 = sadd.s32 1, %s2649_s23 }
  0x43   : > { %p39_p3 = scmp.ge.s32.totalorder %s37_s29, 2  ;;  %s41_s10 = sadd.s32 1, %s2653_s24 }
  0x44   : > { %s52_s12 = sadd.s32 1, %s2637_s20  ;;  %p59_p7 = scmp.ne.s32.totalorder %s2637_s20, %s2633_s19 }
  0x45   : > { %s3096_s29 = smov (%p39_p3, %s37_s29), 0  ;;  %s3098_s10 = smov (!%p39_p3, %s41_s10), %s2653_s24 }
  0x46   : > { %s46_s13 = ssub.s32 %s2649_s23, %s3096_s29  ;;  %p60_p0 = scmp.eq.s32.totalorder %s2657_s25, 0 }
  0x47   : > { %p43_p4 = scmp.ge.s32.totalorder %s3098_s10, 2  ;;  %p2224_p6 = scmp.lt.s32.totalorder %s2657_s25, 4 }
  0x48   : > { %2212 = dma.hbm_to_vmem [thread:$0]  (!%p2785_p13), %s3058_s3, 1024, %s206_s14, [#allocation11], %s2662_s26, %s2662_s26, %s2663_s27  }
  0x49   : > { %s138_s14 = smul.u32 %s2649_s23, %s2653_s24  ;;  %p2828_p13 = por %p60_p0, %p59_p7 }
  0x4a   : > { %s3100_s10 = smov (%p43_p4, %s3098_s10), 0  ;;  %s219_s27 = sand.u32 1, %s2637_s20  }
  0x4b   : > { %3060 = sst [smem:[#allocation25_spill]] %s3100_s10  ;;  %s1832_s18 = sshll.u32 %s2649_s23, 5 }
  0x4c   : > { %s45_s9 = ssub.s32 %s2653_s24, %s3100_s10  ;;  %s139_s8 = smul.u32 %s3100_s10, %s3096_s29 }
  0x4d   : > { %s47_s11 = sor.u32 %s46_s13, %s45_s9  ;;  %s1714_s2 = sshll.u32 %s219_s27, 7 }
  0x4e   : > { %p50_p5 = scmp.eq.s32.totalorder %s47_s11, 0  ;;  %s140_s1 = ssub.s32 %s138_s14, %s139_s8 }
  0x4f   : > { %p141_p8 = scmp.eq.s32.totalorder %s140_s1, 0  ;;  %s3061_s6 = sadd.s32 1, %s2625_s17 }
  0x50   : > { %s2842_s3 = scalar_select %p50_p5, %s2637_s20, %s52_s12  }
  0x51   : > { %s2847_s15 = scalar_select %p141_p8, %s2625_s17, %s3061_s6  }
  0x52   : > { %s1717_s4 = sshll.u32 %s2653_s24, 6  ;;  %s223_s21 = scalar_lea.vmem [#allocation4], %s1714_s2 }
  0x53   : > { %s232_s5 = sadd.s32 %s1832_s18, %s1717_s4  ;;  %s235_s22 = sshll.u32 %s223_s21, 4  ;;  %s236_s22 = int_to_ptr.vmem [resolvable:$true] %s235_s22 }
  0x54   : > { %s1718_s16 = sshll.u32 %s232_s5, 6  ;;  %p2857_p10 = pnand %p2224_p6, %p2828_p13 }
  0x55   : > { %s234_s10 = scalar_lea.hbm %s3016_s0, %s1718_s16  ;;  %s220_s12 = scalar_lea.sflag [#allocation5], %s219_s27 }
  0x56   : > { %p2503_p9 = pneg %p2857_p10  ;;  %s2514_s6 = scalar_lea.vmem %s236_s22, 2048 }
  0x57   : > { %p2515_p12 = scmp.ne.s32.totalorder %s236_s22, %s2514_s6  ;;  %s2664_s2 = smov [#allocation4]  }
  0x58   : > { %s2519_s4 = sshll.u32 %s2664_s2, 4  ;;  %s2520_s4 = int_to_ptr.vmem [resolvable:$false] %s2519_s4 }
  0x59   : > { %p2517_p2 = pnand %p2515_p12, %p2503_p9  ;;  %s2521_s21 = scalar_lea.vmem %s2520_s4, 4096 }
  0x5a   : > { %p2522_p3 = scmp.lt.s32.totalorder %s236_s22, %s2520_s4  ;;  %p2523_p7 = scmp.lt.s32.totalorder %s2521_s21, %s2514_s6 }
  0x5b   : > { %p2518_p1 = pneg %p2517_p2 }
  0x5c   : > { %p2524_p0 = por %p2523_p7, %p2522_p3 }
  0x5e   : > { %p2525_p4 = pnand %p2524_p0, %p2518_p1 }
  0x60   : > { %2528 = shalt.err (!%p2525_p4)
}
  0x61   : > { %s2665_s16 = smov 128   ;;  %s2666_s23 = smov 8  }
  0x62   : > { %2216 = dma.hbm_to_vmem [thread:$0]  (!%p2857_p10), %s234_s10, 2048, %s236_s22, %s220_s12, %s2665_s16, %s2665_s16, %s2666_s23  }
  0x63   : > { %247 = sbr.rel (%p2777_p11) target bundleno = 1181 (0x49d), region = 36  ;;  %s249_s28 = sand.u32 (!%p2777_p11), 1, %s2633_s19  }
  0x64   : > { %s1720_s5 = sshll.u32 (!%p2777_p11), %s249_s28, 7  ;;  %s250_s13 = scalar_lea.sflag (!%p2777_p11), [#allocation5], %s249_s28 }
  0x65   : > { %s2868_s14 = scalar_lea.vmem (!%p2777_p11), [#allocation4], %s1720_s5  ;;  %p3063_p13 = scmp.ne.s32.totalorder (!%p2777_p11), %s3049_s30, 0 }
  0x68   : > { %2600 = dma.done.wait (%p3063_p13), %s250_s13, 2048  }
  0x69   : > { %2602 = vsyncadd (%p3063_p13), %s250_s13, 4294965248  ;;  %s3064_s26 = sld [smem:[#allocation22_spill]] }
  0x6f   : > { %p3065_p6 = scmp.ne.s32.totalorder %s3064_s26, 0 }
  0x71   : > { %2604 = dma.done.wait (%p3065_p6), [#allocation8], 3072  }
  0x72   : > { %2606 = vsyncadd (%p3065_p6), [#allocation8], 4294964224 }
  0x73   : > { %2608 = dma.done.wait (%p3065_p6), [#allocation11], 1024  }
  0x74   : > { %2610 = vsyncadd (%p3065_p6), [#allocation11], 4294966272  ;;  %s3066_s22 = sld [smem:[#allocation18_spill]]  ;;  %v2667_v0 = vmov 0.0  }
  0x75   : > { %s3067_s7 = sld [smem:[#allocation20_spill]]  ;;  %299 = vst [vmem:[#allocation3 + $0x30] sm:$0xff] %v2667_v0  ;;  %300 = vst [vmem:[#allocation3] sm:$0xff] %v2667_v0 }
  0x76   : > { %301 = vst [vmem:[#allocation3 + $0x58] sm:$0xff] %v2667_v0  ;;  %302 = vst [vmem:[#allocation3 + $0x18] sm:$0xff] %v2667_v0 }
  0x77   : > { %303 = vst [vmem:[#allocation3 + $0x50] sm:$0xff] %v2667_v0  ;;  %304 = vst [vmem:[#allocation3 + $0x68] sm:$0xff] %v2667_v0 }
  0x78   : > { %305 = vst [vmem:[#allocation3 + $0x8] sm:$0xff] %v2667_v0  ;;  %306 = vst [vmem:[#allocation3 + $0x48] sm:$0xff] %v2667_v0 }
  0x79   : > { %307 = vst [vmem:[#allocation3 + $0x40] sm:$0xff] %v2667_v0  ;;  %308 = vst [vmem:[#allocation3 + $0x20] sm:$0xff] %v2667_v0 }
  0x7a   : > { %s287_s10 = sand.u32 1, %s3066_s22   ;;  %309 = vst [vmem:[#allocation3 + $0x10] sm:$0xff] %v2667_v0  ;;  %310 = vst [vmem:[#allocation3 + $0x38] sm:$0xff] %v2667_v0 }
  0x7b   : > { %p316_p11 = scmp.eq.s32.totalorder %s3067_s7, 0  ;;  %s1724_s30 = sshll.u32 %s287_s10, 7  ;;  %311 = vst [vmem:[#allocation3 + $0x60] sm:$0xff] %v2667_v0  ;;  %312 = vst [vmem:[#allocation3 + $0x70] sm:$0xff] %v2667_v0 }
  0x7c   : > { %313 = vst [vmem:[#allocation3 + $0x78] sm:$0xff] %v2667_v0  ;;  %314 = vst [vmem:[#allocation3 + $0x28] sm:$0xff] %v2667_v0  ;;  %s2886_s27 = scalar_lea.vmem [#allocation12], %s1724_s30  ;;  %p1725_p5 = scmp.ne.s32.totalorder %s3067_s7, 0 }
  0x7e   : > { %319 = sbr.rel (%p1725_p5) target bundleno = 392 (0x188), region = 60 }
  0x83   : > { %v2327_v1 = vld [vmem:[#allocation7 + $0x78] sm:$0xff]   ;;  %v2329_v3 = vld [vmem:[#allocation7 + $0x70] sm:$0xff]   ;;  %v2331_v5 = vld [vmem:[#allocation7 + $0x68] sm:$0xff]  }
  0x84   : > { %v2328_v2 = vld [vmem:[#allocation7 + $0x38] sm:$0xff]   ;;  %1899 = vmatprep.subr.bf16.mxu0 %v2327_v1  ;;  %2123 = vmatprep.subr.bf16.mxu1 %v2327_v1  ;;  %v2330_v4 = vld [vmem:[#allocation7 + $0x30] sm:$0xff]   ;;  %v2332_v6 = vld [vmem:[#allocation7 + $0x28] sm:$0xff]  }
  0x85   : > { %1900 = vmatpush3.bf16.msra.mxu0 %v2328_v2  ;;  %2131 = vmatpush3.bf16.msra.mxu1 %v2328_v2  ;;  %v2333_v7 = vld [vmem:[#allocation7 + $0x60] sm:$0xff]   ;;  %v2335_v9 = vld [vmem:[#allocation7 + $0x58] sm:$0xff]   ;;  %v2337_v11 = vld [vmem:[#allocation7 + $0x50] sm:$0xff]  }
  0x86   : > { %1901 = vmatprep.subr.bf16.mxu0 %v2329_v3  ;;  %2124 = vmatprep.subr.bf16.mxu1 %v2329_v3  ;;  %v2334_v8 = vld [vmem:[#allocation7 + $0x20] sm:$0xff]   ;;  %v2336_v10 = vld [vmem:[#allocation7 + $0x18] sm:$0xff]   ;;  %v2338_v14 = vld [vmem:[#allocation7 + $0x10] sm:$0xff]  }
  0x87   : > { %v2345_v12 = vld [vmem:[%s2868_s14 + $0x4] ss:$8 sps:$4 sm:$0xff]   ;;  %v2343_v19 = vld [vmem:[%s2868_s14] ss:$8 sps:$4 sm:$0xff]   ;;  %v2349_v21 = vld [vmem:[%s2868_s14 + $0x14] ss:$8 sps:$4 sm:$0xff]  }
  0x88   : > { %v2348_v13 = vld [vmem:[%s2868_s14 + $0x44] ss:$8 sps:$4 sm:$0xff]   ;;  %596 = vmatprep.mubr.bf16.mxu0 %v2345_v12  ;;  %v2346_v20 = vld [vmem:[%s2868_s14 + $0x40] ss:$8 sps:$4 sm:$0xff]   ;;  %v2351_v22 = vld [vmem:[%s2868_s14 + $0x54] ss:$8 sps:$4 sm:$0xff]  }
  0x89   : > { %1902 = vmatpush3.bf16.msra.mxu0 %v2330_v4  ;;  %2132 = vmatpush3.bf16.msra.mxu1 %v2330_v4  ;;  %v2339_v15 = vld [vmem:[#allocation7 + $0x48] sm:$0xff]   ;;  %v2341_v17 = vld [vmem:[#allocation7 + $0x40] sm:$0xff]   ;;  %v2353_v23 = vld [vmem:[%s2868_s14 + $0x10] ss:$8 sps:$4 sm:$0xff]  }
  0x8a   : > { %1903 = vmatprep.subr.bf16.mxu0 %v2331_v5  ;;  %2125 = vmatprep.subr.bf16.mxu1 %v2331_v5  ;;  %v2340_v16 = vld [vmem:[#allocation7 + $0x8] sm:$0xff]   ;;  %v2342_v18 = vld [vmem:[#allocation7] sm:$0xff]   ;;  %v2354_v24 = vld [vmem:[%s2868_s14 + $0x50] ss:$8 sps:$4 sm:$0xff]  }
  0x8b   : > { %628 = vmatprep.mubr.bf16.mxu1 %v2348_v13  ;;  %v2355_v25 = vld [vmem:[%s2868_s14 + $0x24] ss:$8 sps:$4 sm:$0xff]   ;;  %v2359_v27 = vld [vmem:[%s2868_s14 + $0x20] ss:$8 sps:$4 sm:$0xff]   ;;  %v2361_v29 = vld [vmem:[%s2868_s14 + $0x34] ss:$8 sps:$4 sm:$0xff]  }
  0x8c   : > { %v2357_v26 = vld [vmem:[%s2868_s14 + $0x64] ss:$8 sps:$4 sm:$0xff]   ;;  %v2360_v28 = vld [vmem:[%s2868_s14 + $0x60] ss:$8 sps:$4 sm:$0xff]   ;;  %v2363_v30 = vld [vmem:[%s2868_s14 + $0x74] ss:$8 sps:$4 sm:$0xff]  }
  0x8d   : > { %1904 = vmatpush3.bf16.msra.mxu0 %v2332_v6  ;;  %2133 = vmatpush3.bf16.msra.mxu1 %v2332_v6  ;;  %v2365_v31 = vld [vmem:[%s2868_s14 + $0x30] ss:$8 sps:$4 sm:$0xff]   ;;  %v364_v37 = vld [vmem:[#allocation3 + $0x40] sm:$0xff] }
  0x8e   : > { %1905 = vmatprep.subr.bf16.mxu0 %v2333_v7  ;;  %2126 = vmatprep.subr.bf16.mxu1 %v2333_v7  ;;  %v2366_v32 = vld [vmem:[%s2868_s14 + $0x70] ss:$8 sps:$4 sm:$0xff]   ;;  %v357_v45 = vld [vmem:[#allocation3] sm:$0xff] }
  0x8f   : > { %v356_v35 = vld [vmem:[#allocation3 + $0x30] sm:$0xff]  ;;  %v365_v47 = vld [vmem:[#allocation3 + $0x20] sm:$0xff]  ;;  %v358_v55 = vld [vmem:[#allocation3 + $0x58] sm:$0xff] }
  0x90   : > { %v366_v57 = vld [vmem:[#allocation3 + $0x10] sm:$0xff]  ;;  %v359_v1 = vld [vmem:[#allocation3 + $0x18] sm:$0xff]  ;;  %v368_v13 = vld [vmem:[#allocation3 + $0x60] sm:$0xff] }
  0x91   : > { %1906 = vmatpush3.bf16.msra.mxu0 %v2334_v8  ;;  %2134 = vmatpush3.bf16.msra.mxu1 %v2334_v8  ;;  %v367_v3 = vld [vmem:[#allocation3 + $0x38] sm:$0xff] }
  0x92   : > { %1907 = vmatprep.subr.bf16.mxu0 %v2335_v9  ;;  %2127 = vmatprep.subr.bf16.mxu1 %v2335_v9 }
  0x95   : > { %1908 = vmatpush3.bf16.msra.mxu0 %v2336_v10  ;;  %2135 = vmatpush3.bf16.msra.mxu1 %v2336_v10 }
  0x96   : > { %1909 = vmatprep.subr.bf16.mxu0 %v2337_v11  ;;  %2128 = vmatprep.subr.bf16.mxu1 %v2337_v11  ;;  %v360_v11 = vld [vmem:[#allocation3 + $0x50] sm:$0xff] }
  0x99   : > { %1910 = vmatpush3.bf16.msra.mxu0 %v2338_v14  ;;  %2136 = vmatpush3.bf16.msra.mxu1 %v2338_v14 }
  0x9a   : > { %1911 = vmatprep.subr.bf16.mxu0 %v2339_v15  ;;  %2129 = vmatprep.subr.bf16.mxu1 %v2339_v15 }
  0x9d   : > { %1912 = vmatpush3.bf16.msra.mxu0 %v2340_v16  ;;  %2137 = vmatpush3.bf16.msra.mxu1 %v2340_v16 }
  0x9e   : > { %1913 = vmatprep.subr.bf16.mxu0 %v2341_v17  ;;  %2130 = vmatprep.subr.bf16.mxu1 %v2341_v17 }
  0xa1   : > { %1914 = vmatpush3.bf16.msra.mxu0 %v2342_v18  ;;  %2138 = vmatpush3.bf16.msra.mxu1 %v2342_v18 }
  0xa4   : > { %597 = vmatmul.mubr.bf16.vlgmr.msra.gmra.mxu0 %v2343_v19  ;;  %629 = vmatmul.mubr.bf16.vlgmr.msra.gmra.mxu1 %v2346_v20 }
  0xa5   : > { %604 = vmatprep.mubr.bf16.mxu0 %v2349_v21  ;;  %636 = vmatprep.mubr.bf16.mxu1 %v2351_v22  ;;  %v361_v21 = vld [vmem:[#allocation3 + $0x68] sm:$0xff] }
  0xac   : > { %605 = vmatmul.mubr.bf16.gmra.mxu0 %v2353_v23  ;;  %637 = vmatmul.mubr.bf16.gmra.mxu1 %v2354_v24  ;;  %v369_v23 = vld [vmem:[#allocation3 + $0x70] sm:$0xff] }
  0xad   : > { %612 = vmatprep.mubr.bf16.mxu0 %v2355_v25  ;;  %644 = vmatprep.mubr.bf16.mxu1 %v2357_v26 }
  0xb4   : > { %613 = vmatmul.mubr.bf16.gmra.mxu0 %v2359_v27  ;;  %645 = vmatmul.mubr.bf16.gmra.mxu1 %v2360_v28 }
  0xb5   : > { %620 = vmatprep.mubr.bf16.mxu0 %v2361_v29  ;;  %652 = vmatprep.mubr.bf16.mxu1 %v2363_v30 }
  0xbc   : > { %621 = vmatmul.mubr.bf16.gmra.mxu0 %v2365_v31  ;;  %653 = vmatmul.mubr.bf16.gmra.mxu1 %v2366_v32  ;;  %v362_v31 = vld [vmem:[#allocation3 + $0x8] sm:$0xff] }
 0x164   : > { %v1915_v33 = vpop.f32.mrf.mxu0  ;;  %v1939_v34 = vpop.f32.mrf.mxu1 }
 0x166   : > { %v1916_v36 = vpop.f32.mrf.mxu0  ;;  %v1940_v38 = vpop.f32.mrf.mxu1 }
 0x167   : > { %v1917_v39 = vadd.f32 %v1916_v36, %v1915_v33  ;;  %v1941_v40 = vadd.f32 %v1940_v38, %v1939_v34  ;;  %v370_v33 = vld [vmem:[#allocation3 + $0x78] sm:$0xff] }
 0x168   : > { %v1918_v41 = vpop.f32.mrf.mxu0  ;;  %v1942_v42 = vpop.f32.mrf.mxu1 }
 0x169   : > { %v661_v43 = vadd.f32 %v1917_v39, %v356_v35  ;;  %v669_v44 = vadd.f32 %v1941_v40, %v364_v37 }
 0x16a   : > { %v1919_v46 = vpop.f32.mrf.mxu0  ;;  %v1943_v48 = vpop.f32.mrf.mxu1 }
 0x16b   : > { %677 = vst [vmem:[#allocation3 + $0x30] sm:$0xff] %v661_v43  ;;  %685 = vst [vmem:[#allocation3 + $0x40] sm:$0xff] %v669_v44  ;;  %v1920_v49 = vadd.f32 %v1919_v46, %v1918_v41  ;;  %v1944_v50 = vadd.f32 %v1943_v48, %v1942_v42  ;;  %v363_v41 = vld [vmem:[#allocation3 + $0x48] sm:$0xff] }
 0x16c   : > { %v1921_v51 = vpop.f32.mrf.mxu0  ;;  %v1945_v52 = vpop.f32.mrf.mxu1  ;;  %v371_v43 = vld [vmem:[#allocation3 + $0x28] sm:$0xff] }
 0x16d   : > { %v662_v53 = vadd.f32 %v1920_v49, %v357_v45  ;;  %v670_v54 = vadd.f32 %v1944_v50, %v365_v47 }
 0x16e   : > { %v1922_v56 = vpop.f32.mrf.mxu0  ;;  %v1946_v58 = vpop.f32.mrf.mxu1 }
 0x16f   : > { %678 = vst [vmem:[#allocation3] sm:$0xff] %v662_v53  ;;  %686 = vst [vmem:[#allocation3 + $0x20] sm:$0xff] %v670_v54  ;;  %v1923_v59 = vadd.f32 %v1922_v56, %v1921_v51  ;;  %v1947_v60 = vadd.f32 %v1946_v58, %v1945_v52 }
 0x170   : > { %v1924_v61 = vpop.f32.mrf.mxu0  ;;  %v1948_v62 = vpop.f32.mrf.mxu1 }
 0x171   : > { %v663_v63 = vadd.f32 %v1923_v59, %v358_v55  ;;  %v671_v0 = vadd.f32 %v1947_v60, %v366_v57 }
 0x172   : > { %v1925_v2 = vpop.f32.mrf.mxu0  ;;  %v1949_v4 = vpop.f32.mrf.mxu1 }
 0x173   : > { %679 = vst [vmem:[#allocation3 + $0x58] sm:$0xff] %v663_v63  ;;  %687 = vst [vmem:[#allocation3 + $0x10] sm:$0xff] %v671_v0  ;;  %v1926_v5 = vadd.f32 %v1925_v2, %v1924_v61  ;;  %v1950_v6 = vadd.f32 %v1949_v4, %v1948_v62 }
 0x174   : > { %v1927_v7 = vpop.f32.mrf.mxu0  ;;  %v1951_v8 = vpop.f32.mrf.mxu1 }
 0x175   : > { %v664_v9 = vadd.f32 %v1926_v5, %v359_v1  ;;  %v672_v10 = vadd.f32 %v1950_v6, %v367_v3 }
 0x176   : > { %v1928_v12 = vpop.f32.mrf.mxu0  ;;  %v1952_v14 = vpop.f32.mrf.mxu1 }
 0x177   : > { %680 = vst [vmem:[#allocation3 + $0x18] sm:$0xff] %v664_v9  ;;  %688 = vst [vmem:[#allocation3 + $0x38] sm:$0xff] %v672_v10  ;;  %v1929_v15 = vadd.f32 %v1928_v12, %v1927_v7  ;;  %v1953_v16 = vadd.f32 %v1952_v14, %v1951_v8 }
 0x178   : > { %v1930_v17 = vpop.f32.mrf.mxu0  ;;  %v1954_v18 = vpop.f32.mrf.mxu1 }
 0x179   : > { %v665_v19 = vadd.f32 %v1929_v15, %v360_v11  ;;  %v673_v20 = vadd.f32 %v1953_v16, %v368_v13 }
 0x17a   : > { %v1931_v22 = vpop.f32.mrf.mxu0  ;;  %v1955_v24 = vpop.f32.mrf.mxu1 }
 0x17b   : > { %681 = vst [vmem:[#allocation3 + $0x50] sm:$0xff] %v665_v19  ;;  %689 = vst [vmem:[#allocation3 + $0x60] sm:$0xff] %v673_v20  ;;  %v1932_v25 = vadd.f32 %v1931_v22, %v1930_v17  ;;  %v1956_v26 = vadd.f32 %v1955_v24, %v1954_v18 }
 0x17c   : > { %v1933_v27 = vpop.f32.mrf.mxu0  ;;  %v1957_v28 = vpop.f32.mrf.mxu1 }
 0x17d   : > { %v666_v29 = vadd.f32 %v1932_v25, %v361_v21  ;;  %v674_v30 = vadd.f32 %v1956_v26, %v369_v23 }
 0x17e   : > { %v1934_v32 = vpop.f32.mrf.mxu0  ;;  %v1958_v34 = vpop.f32.mrf.mxu1 }
 0x17f   : > { %682 = vst [vmem:[#allocation3 + $0x68] sm:$0xff] %v666_v29  ;;  %690 = vst [vmem:[#allocation3 + $0x70] sm:$0xff] %v674_v30  ;;  %v1935_v35 = vadd.f32 %v1934_v32, %v1933_v27  ;;  %v1959_v36 = vadd.f32 %v1958_v34, %v1957_v28 }
 0x180   : > { %v1936_v37 = vpop.f32.mrf.mxu0  ;;  %v1960_v38 = vpop.f32.mrf.mxu1 }
 0x181   : > { %v667_v39 = vadd.f32 %v1935_v35, %v362_v31  ;;  %v675_v40 = vadd.f32 %v1959_v36, %v370_v33 }
 0x182   : > { %v1937_v42 = vpop.f32.mrf.mxu0  ;;  %v1961_v44 = vpop.f32.mrf.mxu1 }
 0x183   : > { %683 = vst [vmem:[#allocation3 + $0x8] sm:$0xff] %v667_v39  ;;  %691 = vst [vmem:[#allocation3 + $0x78] sm:$0xff] %v675_v40  ;;  %v1938_v45 = vadd.f32 %v1937_v42, %v1936_v37  ;;  %v1962_v46 = vadd.f32 %v1961_v44, %v1960_v38 }
 0x185   : > { %v668_v47 = vadd.f32 %v1938_v45, %v363_v41  ;;  %v676_v48 = vadd.f32 %v1962_v46, %v371_v43 }
 0x187   : > { %684 = vst [vmem:[#allocation3 + $0x48] sm:$0xff] %v668_v47  ;;  %692 = vst [vmem:[#allocation3 + $0x28] sm:$0xff] %v676_v48 }
 0x188 PF: > { %s3068_s18 = sld [smem:[#allocation20_spill]] }
 0x18e   : > { %p693_p8 = scmp.eq.s32.totalorder %s3068_s18, 1  ;;  %p1758_p10 = scmp.ne.s32.totalorder %s3068_s18, 1 }
 0x190   : > { %696 = sbr.rel (%p1758_p10) target bundleno = 666 (0x29a), region = 64 }
 0x195   : > { %v2367_v49 = vld [vmem:[#allocation2 + $0x78] sm:$0xff]   ;;  %v2369_v51 = vld [vmem:[#allocation2 + $0x70] sm:$0xff]   ;;  %v2371_v53 = vld [vmem:[#allocation2 + $0x68] sm:$0xff]  }
 0x196   : > { %v2368_v50 = vld [vmem:[#allocation2 + $0x38] sm:$0xff]   ;;  %1963 = vmatprep.subr.bf16.mxu0 %v2367_v49  ;;  %2139 = vmatprep.subr.bf16.mxu1 %v2367_v49  ;;  %v2370_v52 = vld [vmem:[#allocation2 + $0x30] sm:$0xff]   ;;  %v2372_v54 = vld [vmem:[#allocation2 + $0x28] sm:$0xff]  }
 0x197   : > { %1964 = vmatpush3.bf16.msra.mxu0 %v2368_v50  ;;  %2147 = vmatpush3.bf16.msra.mxu1 %v2368_v50  ;;  %v2373_v55 = vld [vmem:[#allocation2 + $0x60] sm:$0xff]   ;;  %v2375_v57 = vld [vmem:[#allocation2 + $0x58] sm:$0xff]   ;;  %v2377_v59 = vld [vmem:[#allocation2 + $0x50] sm:$0xff]  }
 0x198   : > { %1965 = vmatprep.subr.bf16.mxu0 %v2369_v51  ;;  %2140 = vmatprep.subr.bf16.mxu1 %v2369_v51  ;;  %v2374_v56 = vld [vmem:[#allocation2 + $0x20] sm:$0xff]   ;;  %v2376_v58 = vld [vmem:[#allocation2 + $0x18] sm:$0xff]   ;;  %v2378_v62 = vld [vmem:[#allocation2 + $0x10] sm:$0xff]  }
 0x199   : > { %v2385_v60 = vld [vmem:[%s2868_s14 + $0x4] ss:$8 sps:$4 sm:$0xff]   ;;  %v2383_v3 = vld [vmem:[%s2868_s14] ss:$8 sps:$4 sm:$0xff]   ;;  %v2389_v5 = vld [vmem:[%s2868_s14 + $0x14] ss:$8 sps:$4 sm:$0xff]  }
 0x19a   : > { %v2388_v61 = vld [vmem:[%s2868_s14 + $0x44] ss:$8 sps:$4 sm:$0xff]   ;;  %973 = vmatprep.mubr.bf16.mxu0 %v2385_v60  ;;  %v2386_v4 = vld [vmem:[%s2868_s14 + $0x40] ss:$8 sps:$4 sm:$0xff]   ;;  %v2391_v6 = vld [vmem:[%s2868_s14 + $0x54] ss:$8 sps:$4 sm:$0xff]  }
 0x19b   : > { %1966 = vmatpush3.bf16.msra.mxu0 %v2370_v52  ;;  %2148 = vmatpush3.bf16.msra.mxu1 %v2370_v52  ;;  %v2379_v63 = vld [vmem:[#allocation2 + $0x48] sm:$0xff]   ;;  %v2381_v1 = vld [vmem:[#allocation2 + $0x40] sm:$0xff]   ;;  %v2393_v7 = vld [vmem:[%s2868_s14 + $0x10] ss:$8 sps:$4 sm:$0xff]  }
 0x19c   : > { %1967 = vmatprep.subr.bf16.mxu0 %v2371_v53  ;;  %2141 = vmatprep.subr.bf16.mxu1 %v2371_v53  ;;  %v2380_v0 = vld [vmem:[#allocation2 + $0x8] sm:$0xff]   ;;  %v2382_v2 = vld [vmem:[#allocation2] sm:$0xff]   ;;  %v2394_v8 = vld [vmem:[%s2868_s14 + $0x50] ss:$8 sps:$4 sm:$0xff]  }
 0x19d   : > { %1005 = vmatprep.mubr.bf16.mxu1 %v2388_v61  ;;  %v2395_v9 = vld [vmem:[%s2868_s14 + $0x24] ss:$8 sps:$4 sm:$0xff]   ;;  %v2399_v11 = vld [vmem:[%s2868_s14 + $0x20] ss:$8 sps:$4 sm:$0xff]   ;;  %v2401_v13 = vld [vmem:[%s2868_s14 + $0x34] ss:$8 sps:$4 sm:$0xff]  }
 0x19e   : > { %v2397_v10 = vld [vmem:[%s2868_s14 + $0x64] ss:$8 sps:$4 sm:$0xff]   ;;  %v2400_v12 = vld [vmem:[%s2868_s14 + $0x60] ss:$8 sps:$4 sm:$0xff]   ;;  %v2403_v14 = vld [vmem:[%s2868_s14 + $0x74] ss:$8 sps:$4 sm:$0xff]  }
 0x19f   : > { %1968 = vmatpush3.bf16.msra.mxu0 %v2372_v54  ;;  %2149 = vmatpush3.bf16.msra.mxu1 %v2372_v54  ;;  %v2405_v15 = vld [vmem:[%s2868_s14 + $0x30] ss:$8 sps:$4 sm:$0xff]   ;;  %v741_v21 = vld [vmem:[#allocation3 + $0x40] sm:$0xff] }
 0x1a0   : > { %1969 = vmatprep.subr.bf16.mxu0 %v2373_v55  ;;  %2142 = vmatprep.subr.bf16.mxu1 %v2373_v55  ;;  %v2406_v16 = vld [vmem:[%s2868_s14 + $0x70] ss:$8 sps:$4 sm:$0xff]   ;;  %v734_v29 = vld [vmem:[#allocation3] sm:$0xff] }
 0x1a1   : > { %v733_v19 = vld [vmem:[#allocation3 + $0x30] sm:$0xff]  ;;  %v742_v31 = vld [vmem:[#allocation3 + $0x20] sm:$0xff]  ;;  %v735_v39 = vld [vmem:[#allocation3 + $0x58] sm:$0xff] }
 0x1a2   : > { %v743_v41 = vld [vmem:[#allocation3 + $0x10] sm:$0xff]  ;;  %v736_v49 = vld [vmem:[#allocation3 + $0x18] sm:$0xff]  ;;  %v745_v61 = vld [vmem:[#allocation3 + $0x60] sm:$0xff] }
 0x1a3   : > { %1970 = vmatpush3.bf16.msra.mxu0 %v2374_v56  ;;  %2150 = vmatpush3.bf16.msra.mxu1 %v2374_v56  ;;  %v744_v51 = vld [vmem:[#allocation3 + $0x38] sm:$0xff] }
 0x1a4   : > { %1971 = vmatprep.subr.bf16.mxu0 %v2375_v57  ;;  %2143 = vmatprep.subr.bf16.mxu1 %v2375_v57 }
 0x1a7   : > { %1972 = vmatpush3.bf16.msra.mxu0 %v2376_v58  ;;  %2151 = vmatpush3.bf16.msra.mxu1 %v2376_v58 }
 0x1a8   : > { %1973 = vmatprep.subr.bf16.mxu0 %v2377_v59  ;;  %2144 = vmatprep.subr.bf16.mxu1 %v2377_v59  ;;  %v737_v59 = vld [vmem:[#allocation3 + $0x50] sm:$0xff] }
 0x1ab   : > { %1974 = vmatpush3.bf16.msra.mxu0 %v2378_v62  ;;  %2152 = vmatpush3.bf16.msra.mxu1 %v2378_v62 }
 0x1ac   : > { %1975 = vmatprep.subr.bf16.mxu0 %v2379_v63  ;;  %2145 = vmatprep.subr.bf16.mxu1 %v2379_v63 }
 0x1af   : > { %1976 = vmatpush3.bf16.msra.mxu0 %v2380_v0  ;;  %2153 = vmatpush3.bf16.msra.mxu1 %v2380_v0 }
 0x1b0   : > { %1977 = vmatprep.subr.bf16.mxu0 %v2381_v1  ;;  %2146 = vmatprep.subr.bf16.mxu1 %v2381_v1 }
 0x1b3   : > { %1978 = vmatpush3.bf16.msra.mxu0 %v2382_v2  ;;  %2154 = vmatpush3.bf16.msra.mxu1 %v2382_v2 }
 0x1b6   : > { %974 = vmatmul.mubr.bf16.vlgmr.msra.gmra.mxu0 %v2383_v3  ;;  %1006 = vmatmul.mubr.bf16.vlgmr.msra.gmra.mxu1 %v2386_v4 }
 0x1b7   : > { %981 = vmatprep.mubr.bf16.mxu0 %v2389_v5  ;;  %1013 = vmatprep.mubr.bf16.mxu1 %v2391_v6  ;;  %v738_v5 = vld [vmem:[#allocation3 + $0x68] sm:$0xff] }
 0x1be   : > { %982 = vmatmul.mubr.bf16.gmra.mxu0 %v2393_v7  ;;  %1014 = vmatmul.mubr.bf16.gmra.mxu1 %v2394_v8  ;;  %v746_v7 = vld [vmem:[#allocation3 + $0x70] sm:$0xff] }
 0x1bf   : > { %989 = vmatprep.mubr.bf16.mxu0 %v2395_v9  ;;  %1021 = vmatprep.mubr.bf16.mxu1 %v2397_v10 }
 0x1c6   : > { %990 = vmatmul.mubr.bf16.gmra.mxu0 %v2399_v11  ;;  %1022 = vmatmul.mubr.bf16.gmra.mxu1 %v2400_v12 }
 0x1c7   : > { %997 = vmatprep.mubr.bf16.mxu0 %v2401_v13  ;;  %1029 = vmatprep.mubr.bf16.mxu1 %v2403_v14 }
 0x1ce   : > { %998 = vmatmul.mubr.bf16.gmra.mxu0 %v2405_v15  ;;  %1030 = vmatmul.mubr.bf16.gmra.mxu1 %v2406_v16  ;;  %v739_v15 = vld [vmem:[#allocation3 + $0x8] sm:$0xff] }
 0x276   : > { %v1979_v17 = vpop.f32.mrf.mxu0  ;;  %v2003_v18 = vpop.f32.mrf.mxu1 }
 0x278   : > { %v1980_v20 = vpop.f32.mrf.mxu0  ;;  %v2004_v22 = vpop.f32.mrf.mxu1 }
 0x279   : > { %v1981_v23 = vadd.f32 %v1980_v20, %v1979_v17  ;;  %v2005_v24 = vadd.f32 %v2004_v22, %v2003_v18  ;;  %v747_v17 = vld [vmem:[#allocation3 + $0x78] sm:$0xff] }
 0x27a   : > { %v1982_v25 = vpop.f32.mrf.mxu0  ;;  %v2006_v26 = vpop.f32.mrf.mxu1 }
 0x27b   : > { %v1038_v27 = vadd.f32 %v1981_v23, %v733_v19  ;;  %v1046_v28 = vadd.f32 %v2005_v24, %v741_v21 }
 0x27c   : > { %v1983_v30 = vpop.f32.mrf.mxu0  ;;  %v2007_v32 = vpop.f32.mrf.mxu1 }
 0x27d   : > { %1054 = vst [vmem:[#allocation3 + $0x30] sm:$0xff] %v1038_v27  ;;  %1062 = vst [vmem:[#allocation3 + $0x40] sm:$0xff] %v1046_v28  ;;  %v1984_v33 = vadd.f32 %v1983_v30, %v1982_v25  ;;  %v2008_v34 = vadd.f32 %v2007_v32, %v2006_v26  ;;  %v740_v25 = vld [vmem:[#allocation3 + $0x48] sm:$0xff] }
 0x27e   : > { %v1985_v35 = vpop.f32.mrf.mxu0  ;;  %v2009_v36 = vpop.f32.mrf.mxu1  ;;  %v748_v27 = vld [vmem:[#allocation3 + $0x28] sm:$0xff] }
 0x27f   : > { %v1039_v37 = vadd.f32 %v1984_v33, %v734_v29  ;;  %v1047_v38 = vadd.f32 %v2008_v34, %v742_v31 }
 0x280   : > { %v1986_v40 = vpop.f32.mrf.mxu0  ;;  %v2010_v42 = vpop.f32.mrf.mxu1 }
 0x281   : > { %1055 = vst [vmem:[#allocation3] sm:$0xff] %v1039_v37  ;;  %1063 = vst [vmem:[#allocation3 + $0x20] sm:$0xff] %v1047_v38  ;;  %v1987_v43 = vadd.f32 %v1986_v40, %v1985_v35  ;;  %v2011_v44 = vadd.f32 %v2010_v42, %v2009_v36 }
 0x282   : > { %v1988_v45 = vpop.f32.mrf.mxu0  ;;  %v2012_v46 = vpop.f32.mrf.mxu1 }
 0x283   : > { %v1040_v47 = vadd.f32 %v1987_v43, %v735_v39  ;;  %v1048_v48 = vadd.f32 %v2011_v44, %v743_v41 }
 0x284   : > { %v1989_v50 = vpop.f32.mrf.mxu0  ;;  %v2013_v52 = vpop.f32.mrf.mxu1 }
 0x285   : > { %1056 = vst [vmem:[#allocation3 + $0x58] sm:$0xff] %v1040_v47  ;;  %1064 = vst [vmem:[#allocation3 + $0x10] sm:$0xff] %v1048_v48  ;;  %v1990_v53 = vadd.f32 %v1989_v50, %v1988_v45  ;;  %v2014_v54 = vadd.f32 %v2013_v52, %v2012_v46 }
 0x286   : > { %v1991_v55 = vpop.f32.mrf.mxu0  ;;  %v2015_v56 = vpop.f32.mrf.mxu1 }
 0x287   : > { %v1041_v57 = vadd.f32 %v1990_v53, %v736_v49  ;;  %v1049_v58 = vadd.f32 %v2014_v54, %v744_v51 }
 0x288   : > { %v1992_v60 = vpop.f32.mrf.mxu0  ;;  %v2016_v62 = vpop.f32.mrf.mxu1 }
 0x289   : > { %1057 = vst [vmem:[#allocation3 + $0x18] sm:$0xff] %v1041_v57  ;;  %1065 = vst [vmem:[#allocation3 + $0x38] sm:$0xff] %v1049_v58  ;;  %v1993_v63 = vadd.f32 %v1992_v60, %v1991_v55  ;;  %v2017_v0 = vadd.f32 %v2016_v62, %v2015_v56 }
 0x28a   : > { %v1994_v1 = vpop.f32.mrf.mxu0  ;;  %v2018_v2 = vpop.f32.mrf.mxu1 }
 0x28b   : > { %v1042_v3 = vadd.f32 %v1993_v63, %v737_v59  ;;  %v1050_v4 = vadd.f32 %v2017_v0, %v745_v61 }
 0x28c   : > { %v1995_v6 = vpop.f32.mrf.mxu0  ;;  %v2019_v8 = vpop.f32.mrf.mxu1 }
 0x28d   : > { %1058 = vst [vmem:[#allocation3 + $0x50] sm:$0xff] %v1042_v3  ;;  %1066 = vst [vmem:[#allocation3 + $0x60] sm:$0xff] %v1050_v4  ;;  %v1996_v9 = vadd.f32 %v1995_v6, %v1994_v1  ;;  %v2020_v10 = vadd.f32 %v2019_v8, %v2018_v2 }
 0x28e   : > { %v1997_v11 = vpop.f32.mrf.mxu0  ;;  %v2021_v12 = vpop.f32.mrf.mxu1 }
 0x28f   : > { %v1043_v13 = vadd.f32 %v1996_v9, %v738_v5  ;;  %v1051_v14 = vadd.f32 %v2020_v10, %v746_v7 }
 0x290   : > { %v1998_v16 = vpop.f32.mrf.mxu0  ;;  %v2022_v18 = vpop.f32.mrf.mxu1 }
 0x291   : > { %1059 = vst [vmem:[#allocation3 + $0x68] sm:$0xff] %v1043_v13  ;;  %1067 = vst [vmem:[#allocation3 + $0x70] sm:$0xff] %v1051_v14  ;;  %v1999_v19 = vadd.f32 %v1998_v16, %v1997_v11  ;;  %v2023_v20 = vadd.f32 %v2022_v18, %v2021_v12 }
 0x292   : > { %v2000_v21 = vpop.f32.mrf.mxu0  ;;  %v2024_v22 = vpop.f32.mrf.mxu1 }
 0x293   : > { %v1044_v23 = vadd.f32 %v1999_v19, %v739_v15  ;;  %v1052_v24 = vadd.f32 %v2023_v20, %v747_v17 }
 0x294   : > { %v2001_v26 = vpop.f32.mrf.mxu0  ;;  %v2025_v28 = vpop.f32.mrf.mxu1 }
 0x295   : > { %1060 = vst [vmem:[#allocation3 + $0x8] sm:$0xff] %v1044_v23  ;;  %1068 = vst [vmem:[#allocation3 + $0x78] sm:$0xff] %v1052_v24  ;;  %v2002_v29 = vadd.f32 %v2001_v26, %v2000_v21  ;;  %v2026_v30 = vadd.f32 %v2025_v28, %v2024_v22 }
 0x297   : > { %v1045_v31 = vadd.f32 %v2002_v29, %v740_v25  ;;  %v1053_v32 = vadd.f32 %v2026_v30, %v748_v27 }
 0x299   : > { %1061 = vst [vmem:[#allocation3 + $0x48] sm:$0xff] %v1045_v31  ;;  %1069 = vst [vmem:[#allocation3 + $0x28] sm:$0xff] %v1053_v32 }
 0x29a PF: > { %1073 = sbr.rel (!%p316_p11) target bundleno = 911 (0x38f), region = 68  ;;  %v2407_v33 = vld [vmem:[#allocation9 + $0x38] sm:$0xff] (%p316_p11)   ;;  %v2408_v34 = vld [vmem:[#allocation9 + $0x30] sm:$0xff] (%p316_p11)   ;;  %v2409_v35 = vld [vmem:[#allocation9 + $0x28] sm:$0xff] (%p316_p11)   ;;  %s3070_s8 = sld [smem:[#allocation19_spill]] (%p316_p11) }
 0x29b   : > { %2059 = vmatprep.subr.bf16.mxu0 (%p316_p11), %v2407_v33  ;;  %2155 = vmatprep.subr.bf16.mxu1 (%p316_p11), %v2407_v33  ;;  %v2410_v36 = vld [vmem:[#allocation9 + $0x20] sm:$0xff] (%p316_p11)   ;;  %v1074_v37 = vld [vmem:[#allocation3 + $0x30] sm:$0xff] (%p316_p11)  ;;  %v2411_v43 = vld [vmem:[#allocation9 + $0x18] sm:$0xff] (%p316_p11)  }
 0x29c   : > { %2060 = vmatpush3.bf16.msra.mxu0 (%p316_p11), %v2407_v33  ;;  %2163 = vmatpush3.bf16.msra.mxu1 (%p316_p11), %v2407_v33  ;;  %v1075_v38 = vld [vmem:[#allocation3] sm:$0xff] (%p316_p11)  ;;  %v2412_v44 = vld [vmem:[#allocation9 + $0x10] sm:$0xff] (%p316_p11)   ;;  %v2413_v45 = vld [vmem:[#allocation9 + $0x8] sm:$0xff] (%p316_p11)  }
 0x29d   : > { %2061 = vmatprep.subr.bf16.mxu0 (%p316_p11), %v2408_v34  ;;  %2156 = vmatprep.subr.bf16.mxu1 (%p316_p11), %v2408_v34  ;;  %v1082_v39 = vld [vmem:[#allocation3 + $0x40] sm:$0xff] (%p316_p11)  ;;  %v1090_v40 = vpack.c.bf16 (%p316_p11), %v1075_v38, %v1074_v37  ;;  %v1076_v47 = vld [vmem:[#allocation3 + $0x58] sm:$0xff] (%p316_p11)  ;;  %v1084_v49 = vld [vmem:[#allocation3 + $0x10] sm:$0xff] (%p316_p11) }
 0x29e   : > { %v1083_v41 = vld [vmem:[#allocation3 + $0x20] sm:$0xff] (%p316_p11)  ;;  %v1077_v48 = vld [vmem:[#allocation3 + $0x18] sm:$0xff] (%p316_p11)  ;;  %v1078_v51 = vld [vmem:[#allocation3 + $0x50] sm:$0xff] (%p316_p11) }
 0x29f   : > { %v1094_v42 = vpack.c.bf16 %v1083_v41, %v1082_v39  ;;  %2075 = vmatprep.mubr.bf16.mxu0 %v1090_v40  ;;  %v2414_v46 = vld [vmem:[#allocation9] sm:$0xff]   ;;  %v1085_v50 = vld [vmem:[#allocation3 + $0x38] sm:$0xff]  ;;  %v1079_v52 = vld [vmem:[#allocation3 + $0x68] sm:$0xff]  ;;  %v1091_v55 = vpack.c.bf16 %v1077_v48, %v1076_v47 }
 0x2a0   : > { %2062 = vmatpush3.bf16.msra.mxu0 %v2408_v34  ;;  %2164 = vmatpush3.bf16.msra.mxu1 %v2408_v34  ;;  %v1086_v53 = vld [vmem:[#allocation3 + $0x60] sm:$0xff]  ;;  %v1087_v54 = vld [vmem:[#allocation3 + $0x70] sm:$0xff]  ;;  %v1095_v56 = vpack.c.bf16 %v1085_v50, %v1084_v49  ;;  %v1092_v57 = vpack.c.bf16 %v1079_v52, %v1078_v51  ;;  %v1080_v59 = vld [vmem:[#allocation3 + $0x8] sm:$0xff]  ;;  %s1800_s11 = sshll.u32 %s3070_s8, 7 }
 0x2a1   : > { %2063 = vmatprep.subr.bf16.mxu0 %v2409_v35  ;;  %2157 = vmatprep.subr.bf16.mxu1 %v2409_v35  ;;  %v1096_v58 = vpack.c.bf16 %v1087_v54, %v1086_v53  ;;  %v1081_v60 = vld [vmem:[#allocation3 + $0x48] sm:$0xff]  ;;  %v1088_v61 = vld [vmem:[#allocation3 + $0x78] sm:$0xff]  ;;  %s1340_s1 = sshra.s32 %s1800_s11, 3 }
 0x2a2   : > { %2083 = vmatprep.mubr.bf16.mxu1 %v1094_v42  ;;  %v1089_v62 = vld [vmem:[#allocation3 + $0x28] sm:$0xff]  ;;  %v1093_v63 = vpack.c.bf16 %v1081_v60, %v1080_v59  ;;  %s1817_s12 = sshll.u32 %s1340_s1, 2 }
 0x2a3   : > { %v1097_v0 = vpack.c.bf16 %v1089_v62, %v1088_v61  ;;  %s1343_s6 = scalar_lea.vmem [#allocation2], %s1817_s12 }
 0x2a4   : > { %2064 = vmatpush3.bf16.msra.mxu0 %v2409_v35  ;;  %2165 = vmatpush3.bf16.msra.mxu1 %v2409_v35 }
 0x2a5   : > { %2065 = vmatprep.subr.bf16.mxu0 %v2410_v36  ;;  %2158 = vmatprep.subr.bf16.mxu1 %v2410_v36 }
 0x2a8   : > { %2066 = vmatpush3.bf16.msra.mxu0 %v2410_v36  ;;  %2166 = vmatpush3.bf16.msra.mxu1 %v2410_v36 }
 0x2a9   : > { %2067 = vmatprep.subr.bf16.mxu0 %v2411_v43  ;;  %2159 = vmatprep.subr.bf16.mxu1 %v2411_v43 }
 0x2ac   : > { %2068 = vmatpush3.bf16.msra.mxu0 %v2411_v43  ;;  %2167 = vmatpush3.bf16.msra.mxu1 %v2411_v43 }
 0x2ad   : > { %2069 = vmatprep.subr.bf16.mxu0 %v2412_v44  ;;  %2160 = vmatprep.subr.bf16.mxu1 %v2412_v44 }
 0x2b0   : > { %2070 = vmatpush3.bf16.msra.mxu0 %v2412_v44  ;;  %2168 = vmatpush3.bf16.msra.mxu1 %v2412_v44 }
 0x2b1   : > { %2071 = vmatprep.subr.bf16.mxu0 %v2413_v45  ;;  %2161 = vmatprep.subr.bf16.mxu1 %v2413_v45 }
 0x2b4   : > { %2072 = vmatpush3.bf16.msra.mxu0 %v2413_v45  ;;  %2169 = vmatpush3.bf16.msra.mxu1 %v2413_v45 }
 0x2b5   : > { %2073 = vmatprep.subr.bf16.mxu0 %v2414_v46  ;;  %2162 = vmatprep.subr.bf16.mxu1 %v2414_v46 }
 0x2b8   : > { %2074 = vmatpush3.bf16.msra.mxu0 %v2414_v46  ;;  %2170 = vmatpush3.bf16.msra.mxu1 %v2414_v46 }
 0x2bb   : > { %2076 = vmatmul.mubr.bf16.vlgmr.msra.gmra.mxu0 %v1091_v55  ;;  %2084 = vmatmul.mubr.bf16.vlgmr.msra.gmra.mxu1 %v1095_v56 }
 0x2bc   : > { %2079 = vmatprep.mubr.bf16.mxu0 %v1092_v57  ;;  %2087 = vmatprep.mubr.bf16.mxu1 %v1096_v58 }
 0x2c3   : > { %2080 = vmatmul.mubr.bf16.gmra.mxu0 %v1093_v63  ;;  %2088 = vmatmul.mubr.bf16.gmra.mxu1 %v1097_v0 }
 0x37b   : > { %v2077_v1 = vpop.f32.mrf.mxu0  ;;  %v2085_v2 = vpop.f32.mrf.mxu1 }
 0x37c   : > { %v1261_v7 = vmax.f32 %v2077_v1, 0.0  ;;  %v1269_v8 = vmax.f32 %v2085_v2, 0.0 }
 0x37d   : > { %v1196_v3 = vpop.f32.mrf.mxu0  ;;  %v1228_v4 = vpop.f32.mrf.mxu1 }
 0x37e   : > { %v1259_v11 = vmax.f32 %v1196_v3, 0.0  ;;  %v1267_v12 = vmax.f32 %v1228_v4, 0.0 }
 0x37f   : > { %v2078_v5 = vpop.f32.mrf.mxu0  ;;  %v2086_v6 = vpop.f32.mrf.mxu1 }
 0x380   : > { %v1262_v9 = vmax.f32 %v2078_v5, 0.0  ;;  %v1270_v10 = vmax.f32 %v2086_v6, 0.0 }
 0x381   : > { %v1199_v13 = vpop.f32.mrf.mxu0  ;;  %v1231_v14 = vpop.f32.mrf.mxu1 }
 0x382   : > { %v1860_v15 = vpack.c.bf16 %v1262_v9, %v1261_v7  ;;  %v1880_v16 = vpack.c.bf16 %v1270_v10, %v1269_v8  ;;  %v1260_v17 = vmax.f32 %v1199_v13, 0.0  ;;  %v1268_v18 = vmax.f32 %v1231_v14, 0.0 }
 0x383   : > { %v2081_v19 = vpop.f32.mrf.mxu0  ;;  %v2089_v20 = vpop.f32.mrf.mxu1 }
 0x384   : > { %1892 = vst [vmem:[%s1343_s6 + $0x8] sm:$0xff] %v1860_v15   ;;  %1896 = vst [vmem:[%s1343_s6 + $0x28] sm:$0xff] %v1880_v16   ;;  %v1855_v21 = vpack.c.bf16 %v1260_v17, %v1259_v11  ;;  %v1875_v22 = vpack.c.bf16 %v1268_v18, %v1267_v12  ;;  %v1265_v27 = vmax.f32 %v2081_v19, 0.0  ;;  %v1273_v28 = vmax.f32 %v2089_v20, 0.0 }
 0x385   : > { %v1212_v23 = vpop.f32.mrf.mxu0  ;;  %v1244_v24 = vpop.f32.mrf.mxu1 }
 0x386   : > { %1856 = vst [vmem:[%s1343_s6] sm:$0xff] %v1855_v21   ;;  %1895 = vst [vmem:[%s1343_s6 + $0x20] sm:$0xff] %v1875_v22   ;;  %v1263_v31 = vmax.f32 %v1212_v23, 0.0  ;;  %v1271_v32 = vmax.f32 %v1244_v24, 0.0 }
 0x387   : > { %v2082_v25 = vpop.f32.mrf.mxu0  ;;  %v2090_v26 = vpop.f32.mrf.mxu1 }
 0x388   : > { %v1266_v29 = vmax.f32 %v2082_v25, 0.0  ;;  %v1274_v30 = vmax.f32 %v2090_v26, 0.0 }
 0x389   : > { %v1215_v33 = vpop.f32.mrf.mxu0  ;;  %v1247_v34 = vpop.f32.mrf.mxu1 }
 0x38a   : > { %v1870_v35 = vpack.c.bf16 %v1266_v29, %v1265_v27  ;;  %v1890_v36 = vpack.c.bf16 %v1274_v30, %v1273_v28  ;;  %v1264_v37 = vmax.f32 %v1215_v33, 0.0  ;;  %v1272_v38 = vmax.f32 %v1247_v34, 0.0 }
 0x38c   : > { %1894 = vst [vmem:[%s1343_s6 + $0x18] sm:$0xff] %v1870_v35   ;;  %1898 = vst [vmem:[%s1343_s6 + $0x38] sm:$0xff] %v1890_v36   ;;  %v1865_v39 = vpack.c.bf16 %v1264_v37, %v1263_v31  ;;  %v1885_v40 = vpack.c.bf16 %v1272_v38, %v1271_v32 }
 0x38e   : > { %1893 = vst [vmem:[%s1343_s6 + $0x10] sm:$0xff] %v1865_v39   ;;  %1897 = vst [vmem:[%s1343_s6 + $0x30] sm:$0xff] %v1885_v40  }
 0x38f PF: > { %1363 = sbr.rel (!%p693_p8) target bundleno = 1152 (0x480), region = 72  ;;  %v2415_v41 = vld [vmem:[#allocation10 + $0x38] sm:$0xff] (%p693_p8)   ;;  %v2416_v42 = vld [vmem:[#allocation10 + $0x30] sm:$0xff] (%p693_p8)   ;;  %v2417_v43 = vld [vmem:[#allocation10 + $0x28] sm:$0xff] (%p693_p8)  }
 0x390   : > { %2091 = vmatprep.subr.bf16.mxu0 (%p693_p8), %v2415_v41  ;;  %2171 = vmatprep.subr.bf16.mxu1 (%p693_p8), %v2415_v41  ;;  %v2418_v44 = vld [vmem:[#allocation10 + $0x20] sm:$0xff] (%p693_p8)   ;;  %v1364_v45 = vld [vmem:[#allocation3 + $0x30] sm:$0xff] (%p693_p8)  ;;  %v2419_v51 = vld [vmem:[#allocation10 + $0x18] sm:$0xff] (%p693_p8)  }
 0x391   : > { %2092 = vmatpush3.bf16.msra.mxu0 (%p693_p8), %v2415_v41  ;;  %2179 = vmatpush3.bf16.msra.mxu1 (%p693_p8), %v2415_v41  ;;  %v1365_v46 = vld [vmem:[#allocation3] sm:$0xff] (%p693_p8)  ;;  %v2420_v52 = vld [vmem:[#allocation10 + $0x10] sm:$0xff] (%p693_p8)   ;;  %v2421_v53 = vld [vmem:[#allocation10 + $0x8] sm:$0xff] (%p693_p8)  }
 0x392   : > { %2093 = vmatprep.subr.bf16.mxu0 (%p693_p8), %v2416_v42  ;;  %2172 = vmatprep.subr.bf16.mxu1 (%p693_p8), %v2416_v42  ;;  %v1372_v47 = vld [vmem:[#allocation3 + $0x40] sm:$0xff] (%p693_p8)  ;;  %v1380_v48 = vpack.c.bf16 (%p693_p8), %v1365_v46, %v1364_v45  ;;  %v1366_v55 = vld [vmem:[#allocation3 + $0x58] sm:$0xff] (%p693_p8)  ;;  %v1374_v57 = vld [vmem:[#allocation3 + $0x10] sm:$0xff] (%p693_p8) }
 0x393   : > { %v1373_v49 = vld [vmem:[#allocation3 + $0x20] sm:$0xff] (%p693_p8)  ;;  %v1367_v56 = vld [vmem:[#allocation3 + $0x18] sm:$0xff] (%p693_p8)  ;;  %v1368_v59 = vld [vmem:[#allocation3 + $0x50] sm:$0xff] (%p693_p8) }
 0x394   : > { %v1384_v50 = vpack.c.bf16 %v1373_v49, %v1372_v47  ;;  %2107 = vmatprep.mubr.bf16.mxu0 %v1380_v48  ;;  %v2422_v54 = vld [vmem:[#allocation10] sm:$0xff]   ;;  %v1375_v58 = vld [vmem:[#allocation3 + $0x38] sm:$0xff]  ;;  %v1369_v60 = vld [vmem:[#allocation3 + $0x68] sm:$0xff]  ;;  %v1381_v63 = vpack.c.bf16 %v1367_v56, %v1366_v55 }
 0x395   : > { %2094 = vmatpush3.bf16.msra.mxu0 %v2416_v42  ;;  %2180 = vmatpush3.bf16.msra.mxu1 %v2416_v42  ;;  %v1376_v61 = vld [vmem:[#allocation3 + $0x60] sm:$0xff]  ;;  %v1377_v62 = vld [vmem:[#allocation3 + $0x70] sm:$0xff]  ;;  %v1385_v0 = vpack.c.bf16 %v1375_v58, %v1374_v57  ;;  %v1382_v1 = vpack.c.bf16 %v1369_v60, %v1368_v59  ;;  %v1370_v3 = vld [vmem:[#allocation3 + $0x8] sm:$0xff] }
 0x396   : > { %2095 = vmatprep.subr.bf16.mxu0 %v2417_v43  ;;  %2173 = vmatprep.subr.bf16.mxu1 %v2417_v43  ;;  %v1386_v2 = vpack.c.bf16 %v1377_v62, %v1376_v61  ;;  %v1371_v4 = vld [vmem:[#allocation3 + $0x48] sm:$0xff]  ;;  %v1378_v5 = vld [vmem:[#allocation3 + $0x78] sm:$0xff] }
 0x397   : > { %2115 = vmatprep.mubr.bf16.mxu1 %v1384_v50  ;;  %v1379_v6 = vld [vmem:[#allocation3 + $0x28] sm:$0xff]  ;;  %v1383_v7 = vpack.c.bf16 %v1371_v4, %v1370_v3 }
 0x398   : > { %v1387_v8 = vpack.c.bf16 %v1379_v6, %v1378_v5 }
 0x399   : > { %2096 = vmatpush3.bf16.msra.mxu0 %v2417_v43  ;;  %2181 = vmatpush3.bf16.msra.mxu1 %v2417_v43 }
 0x39a   : > { %2097 = vmatprep.subr.bf16.mxu0 %v2418_v44  ;;  %2174 = vmatprep.subr.bf16.mxu1 %v2418_v44 }
 0x39d   : > { %2098 = vmatpush3.bf16.msra.mxu0 %v2418_v44  ;;  %2182 = vmatpush3.bf16.msra.mxu1 %v2418_v44 }
 0x39e   : > { %2099 = vmatprep.subr.bf16.mxu0 %v2419_v51  ;;  %2175 = vmatprep.subr.bf16.mxu1 %v2419_v51 }
 0x3a1   : > { %2100 = vmatpush3.bf16.msra.mxu0 %v2419_v51  ;;  %2183 = vmatpush3.bf16.msra.mxu1 %v2419_v51 }
 0x3a2   : > { %2101 = vmatprep.subr.bf16.mxu0 %v2420_v52  ;;  %2176 = vmatprep.subr.bf16.mxu1 %v2420_v52 }
 0x3a5   : > { %2102 = vmatpush3.bf16.msra.mxu0 %v2420_v52  ;;  %2184 = vmatpush3.bf16.msra.mxu1 %v2420_v52 }
 0x3a6   : > { %2103 = vmatprep.subr.bf16.mxu0 %v2421_v53  ;;  %2177 = vmatprep.subr.bf16.mxu1 %v2421_v53 }
 0x3a9   : > { %2104 = vmatpush3.bf16.msra.mxu0 %v2421_v53  ;;  %2185 = vmatpush3.bf16.msra.mxu1 %v2421_v53 }
 0x3aa   : > { %2105 = vmatprep.subr.bf16.mxu0 %v2422_v54  ;;  %2178 = vmatprep.subr.bf16.mxu1 %v2422_v54 }
 0x3ad   : > { %2106 = vmatpush3.bf16.msra.mxu0 %v2422_v54  ;;  %2186 = vmatpush3.bf16.msra.mxu1 %v2422_v54 }
 0x3b0   : > { %2108 = vmatmul.mubr.bf16.vlgmr.msra.gmra.mxu0 %v1381_v63  ;;  %2116 = vmatmul.mubr.bf16.vlgmr.msra.gmra.mxu1 %v1385_v0 }
 0x3b1   : > { %2111 = vmatprep.mubr.bf16.mxu0 %v1382_v1  ;;  %2119 = vmatprep.mubr.bf16.mxu1 %v1386_v2 }
 0x3b8   : > { %2112 = vmatmul.mubr.bf16.gmra.mxu0 %v1383_v7  ;;  %2120 = vmatmul.mubr.bf16.gmra.mxu1 %v1387_v8 }
 0x470   : > { %v2109_v9 = vpop.f32.mrf.mxu0  ;;  %v2117_v10 = vpop.f32.mrf.mxu1 }
 0x471   : > { %1551 = vst [vmem:[%s2886_s27 + $0x10] sm:$0xff] %v2109_v9  ;;  %1559 = vst [vmem:[%s2886_s27 + $0x50] sm:$0xff] %v2117_v10 }
 0x472   : > { %v1486_v11 = vpop.f32.mrf.mxu0  ;;  %v1518_v12 = vpop.f32.mrf.mxu1 }
 0x473   : > { %1549 = vst [vmem:[%s2886_s27] sm:$0xff] %v1486_v11  ;;  %1557 = vst [vmem:[%s2886_s27 + $0x40] sm:$0xff] %v1518_v12 }
 0x474   : > { %v2110_v13 = vpop.f32.mrf.mxu0  ;;  %v2118_v14 = vpop.f32.mrf.mxu1 }
 0x475   : > { %1552 = vst [vmem:[%s2886_s27 + $0x18] sm:$0xff] %v2110_v13  ;;  %1560 = vst [vmem:[%s2886_s27 + $0x58] sm:$0xff] %v2118_v14 }
 0x476   : > { %v1489_v15 = vpop.f32.mrf.mxu0  ;;  %v1521_v16 = vpop.f32.mrf.mxu1 }
 0x477   : > { %1550 = vst [vmem:[%s2886_s27 + $0x8] sm:$0xff] %v1489_v15  ;;  %1558 = vst [vmem:[%s2886_s27 + $0x48] sm:$0xff] %v1521_v16 }
 0x478   : > { %v2113_v17 = vpop.f32.mrf.mxu0  ;;  %v2121_v18 = vpop.f32.mrf.mxu1 }
 0x479   : > { %1555 = vst [vmem:[%s2886_s27 + $0x30] sm:$0xff] %v2113_v17  ;;  %1563 = vst [vmem:[%s2886_s27 + $0x70] sm:$0xff] %v2121_v18 }
 0x47a   : > { %v1502_v19 = vpop.f32.mrf.mxu0  ;;  %v1534_v20 = vpop.f32.mrf.mxu1 }
 0x47b   : > { %1553 = vst [vmem:[%s2886_s27 + $0x20] sm:$0xff] %v1502_v19  ;;  %1561 = vst [vmem:[%s2886_s27 + $0x60] sm:$0xff] %v1534_v20 }
 0x47c   : > { %v2114_v21 = vpop.f32.mrf.mxu0  ;;  %v2122_v22 = vpop.f32.mrf.mxu1 }
 0x47d   : > { %1556 = vst [vmem:[%s2886_s27 + $0x38] sm:$0xff] %v2114_v21  ;;  %1564 = vst [vmem:[%s2886_s27 + $0x78] sm:$0xff] %v2122_v22 }
 0x47e   : > { %v1505_v23 = vpop.f32.mrf.mxu0  ;;  %v1537_v24 = vpop.f32.mrf.mxu1 }
 0x47f   : > { %1554 = vst [vmem:[%s2886_s27 + $0x28] sm:$0xff] %v1505_v23  ;;  %1562 = vst [vmem:[%s2886_s27 + $0x68] sm:$0xff] %v1537_v24 }
 0x480 PF: > { %s3072_s4 = sld [smem:[#allocation20_spill]]  ;;  %s1580_s5 = sshll.u32 %s2886_s27, 4  ;;  %s2947_s5 = int_to_ptr.vmem [resolvable:$true] %s1580_s5 }
 0x481   : > { %s3073_s21 = sld [smem:[#allocation19_spill]]  ;;  %s2956_s18 = scalar_lea.sflag [#allocation6], %s287_s10 }
 0x482   : > { %s3075_s23 = sld [smem:[#allocation23_spill]]  ;;  %s2529_s9 = scalar_lea.vmem %s2947_s5, 2048 }
 0x483   : > { %s3076_s22 = sld [smem:[#allocation29_spill]]  ;;  %p2530_p9 = scmp.ne.s32.totalorder %s2947_s5, %s2529_s9 }
 0x484   : > { %s2668_s27 = smov [#allocation12]  }
 0x485   : > { %s2533_s8 = sshll.u32 %s2668_s27, 4  ;;  %s2534_s8 = int_to_ptr.vmem [resolvable:$false] %s2533_s8 }
 0x486   : > { %s2535_s11 = scalar_lea.vmem %s2534_s8, 4096  ;;  %p2536_p3 = scmp.lt.s32.totalorder %s2947_s5, %s2534_s8 }
 0x487   : > { %s1573_s28 = smul.u32 %s3073_s21, %s3072_s4  ;;  %p2537_p7 = scmp.lt.s32.totalorder %s2535_s11, %s2529_s9 }
 0x488   : > { %p3078_p12 = scmp.ne.s32.totalorder %s3075_s23, 0 }
 0x489   : > { %s1851_s13 = sshll.u32 %s1573_s28, 11  ;;  %s3077_s7 = smov %s3076_s22 }
 0x48a   : > { %s2952_s30 = scalar_lea.hbm %s3076_s22, %s1851_s13  ;;  %p2531_p2 = pnand %p2530_p9, %p3078_p12 }
 0x48b   : > { %p2538_p0 = por %p2537_p7, %p2536_p3 }
 0x48c   : > { %p2532_p1 = pneg %p2531_p2 }
 0x48e   : > { %p2539_p4 = pnand %p2538_p0, %p2532_p1 }
 0x490   : > { %2542 = shalt.err (!%p2539_p4)
}
 0x491   : > { %s2543_s10 = scalar_lea.hbm %s2952_s30, 2048  ;;  %s2547_s6 = scalar_lea.hbm %s3077_s7, 4096 }
 0x492   : > { %p2544_p13 = scmp.ne.s32.totalorder %s2952_s30, %s2543_s10  ;;  %p2548_p5 = scmp.lt.s32.totalorder %s2952_s30, %s3077_s7 }
 0x493   : > { %p2549_p8 = scmp.lt.s32.totalorder %s2547_s6, %s2543_s10 }
 0x494   : > { %p2545_p6 = pnand %p2544_p13, %p3078_p12 }
 0x495   : > { %p2550_p10 = por %p2549_p8, %p2548_p5 }
 0x496   : > { %p2546_p11 = pneg %p2545_p6 }
 0x498   : > { %p2551_p9 = pnand %p2550_p10, %p2546_p11 }
 0x49a   : > { %2554 = shalt.err (!%p2551_p9)
}
 0x49b   : > { %s2669_s21 = smov 128   ;;  %s2670_s16 = smov 8  }
 0x49c   : > { %2201 = dma.vmem_to_hbm [thread:$0]  (%p3078_p12), %s2947_s5, 2048, %s2952_s30, %s2956_s18, %s2669_s21, %s2669_s21, %s2670_s16  }
 0x49d PF: > { %s3079_s28 = sld [smem:[#allocation17_spill]]  ;;  %p2228_p2 = scmp.ge.s32.totalorder %s2657_s25, 2 }
 0x49e   : > { %s3080_s13 = sld [smem:[#allocation24_spill]] }
 0x4a3   : > { %s1595_s14 = sand.u32 1, %s3079_s28  }
 0x4a4   : > { %p3081_p1 = scmp.ne.s32.totalorder %s3080_s13, 0  ;;  %s1596_s26 = scalar_lea.sflag [#allocation6], %s1595_s14 }
 0x4a6   : > { %p2218_p3 = pnand %p2228_p2, %p3081_p1 }
 0x4a8   : > { %p2219_p7 = pneg %p2218_p3 }
 0x4aa   : > { %2612 = dma.done.wait (%p2219_p7), %s1596_s26, 2048  }
 0x4ab   : > { %2614 = vsyncadd (%p2219_p7), %s1596_s26, 4294965248  ;;  %s22_s25 = sadd.s32 1, %s2657_s25   ;;  %s3082_s22 = sld [smem:[#allocation18_spill]] }
 0x4ac   : > { %p19_p0 = scmp.ge.s32.totalorder %s22_s25, 6   ;;  %s3083_s9 = smov %s2847_s15 }
 0x4ad   : > { %s3084_s21 = sld [smem:[#allocation21_spill]]  ;;  %s3087_s16 = smov %s2625_s17 }
 0x4ae   : > { %s3085_s5 = sld [smem:[#allocation25_spill]]  ;;  %s3088_s17 = smov %s3083_s9 }
 0x4af   : > { %s3089_s18 = smov %s2633_s19  ;;  %s3090_s19 = smov %s2637_s20 }
 0x4b0   : > { %s3091_s20 = smov %s2842_s3  ;;  %s3093_s23 = smov %s3096_s29 }
 0x4b1   : > { %s3086_s15 = smov %s3082_s22  ;;  %s3092_s22 = smov %s2653_s24 }
 0x4b2   :  { %21 = sbr.rel (!%p19_p0) target bundleno = 16 (0x10), region = 116 }
 0x4b4   : > { %s3094_s24 = smov %s3085_s5 }
 0x4b7   :  { %1601 = vsyncpa [#allocation5], 1 }
 0x4b8   :  { %1603 = vsyncpa [#allocation5 + $0x1], 1 }
 0x4b9   :  { %1604 = vsyncpa [#allocation8], 1 }
 0x4ba   :  { %1605 = vsyncpa [#allocation11], 1 }
 0x4bb   :  { %1606 = vsyncpa [#allocation6], 1 }
 0x4bc   :  { %1608 = vsyncpa [#allocation6 + $0x1], 1 }

</bundles_post_ra>
